<compile_context>
chip_gen: v7x
topology: tpu7x:2x2x1
jax: 0.10.0
libtpu: 0.0.40
codegen_flags: <defaults>
</compile_context>

<pallas_src>
import functools
import math

import jax
import jax.numpy as jnp
import numpy as np
from jax.experimental import pallas as pl
from jax.experimental.pallas import tpu as pltpu

BN_EPS = 1e-5
LEAKY_SLOPE = 0.2   # EdgeConv uses nn.LeakyReLU(negative_slope=0.2)

# TODO(synk): get_groups(dataset='NTU', CoM) is an external dependency; a deterministic
#             contiguous joint hierarchy with the same structure is synthesized instead.
GROUPS = [[0, 1, 2, 3], [4, 5, 6, 7], [8, 9, 10, 11], [12, 13, 14, 15]]
LAYERS = [GROUPS[i] + GROUPS[i + 1] for i in range(len(GROUPS) - 1)]
NUM_LAYERS = len(LAYERS)            # the L dim of the input must equal this (= 3)


# ------------------------- static structure matrices (trace-time constants) -------------
def build_avg_matrix(n, num_layers, v, layers):
    """Amat[(n,l), (n,l,v)] = 1/|layers[l]| for v in layers[l]  (hierarchical mean)."""
    a = np.zeros((n * num_layers, n * num_layers * v), np.float32)
    for b in range(n):
        for l in range(num_layers):
            row = b * num_layers + l
            for j in layers[l]:
                a[row, (b * num_layers + l) * v + j] = 1.0 / len(layers[l])
    return jnp.asarray(a)


def build_neighbor_select(n, num_layers):
    """G[j, (n,l), (n,j)] = 1: row-replication matrices realizing the (degenerate, k>=L)
    EdgeConv neighbour gather as tiny matmuls."""
    g = np.zeros((num_layers, n * num_layers, n * num_layers), np.float32)
    for j in range(num_layers):
        for b in range(n):
            for l in range(num_layers):
                g[j, b * num_layers + l, b * num_layers + j] = 1.0
    return jnp.asarray(g)


# ------------------------- Pallas kernel 1: fused attention head ------------------------
def _attention_head_kernel(x_ref, wd_ref, bd_ref, gd_ref, btd_ref, amat_ref, gsel_ref,
                           we1_ref, we2_ref, ge_ref, bte_ref, wa_ref, ba_ref, o_ref):
    """max_T -> conv_down+BN+ReLU -> hier-mean -> EdgeConv -> aggregate + sigmoid."""
    f32 = jnp.float32
    bf16 = jnp.bfloat16

    # ---- x_t = max over T: per-t slab loads keep the live vreg set small ----
    t_steps = x_ref.shape[0]
    xt = x_ref[0]                                        # (M, C), M = N*L*V
    for t in range(1, t_steps):
        xt = jnp.maximum(xt, x_ref[t])

    # ---- conv_down (1x1) + bias + BatchNorm(train) + ReLU ----
    y = jnp.dot(xt.astype(bf16), wd_ref[...].astype(bf16),
                preferred_element_type=f32) + bd_ref[...]
    mu = jnp.mean(y, axis=0, keepdims=True)
    var = jnp.mean(jnp.square(y - mu), axis=0, keepdims=True)   # biased, torch train mode
    y = (y - mu) * jax.lax.rsqrt(var + BN_EPS) * gd_ref[...] + btd_ref[...]
    y = jnp.maximum(y, 0.0)                              # (M, C4)

    # ---- hierarchical sampling: mean over each layer's joints (static avg matrix) ----
    xs = jnp.dot(amat_ref[...], y, preferred_element_type=f32)      # (N*L, C4)

    # ---- EdgeConv: concat(nbr-ctr, ctr) @ We  ==  G_j@(xs@We1) - xs@We1 + xs@We2 ----
    u = jnp.dot(xs.astype(bf16), we1_ref[...].astype(bf16), preferred_element_type=f32)
    w2 = jnp.dot(xs.astype(bf16), we2_ref[...].astype(bf16), preferred_element_type=f32)
    num_l = gsel_ref.shape[0]
    hs = [jnp.dot(gsel_ref[j], u, preferred_element_type=f32) - u + w2
          for j in range(num_l)]                         # conv output per neighbour j
    rows = num_l * hs[0].shape[0]                        # N*L*k rows for the BN stats
    tot = hs[0]
    for j in range(1, num_l):
        tot = tot + hs[j]
    mu_e = jnp.sum(tot, axis=0, keepdims=True) / rows
    sq = jnp.square(hs[0] - mu_e)
    for j in range(1, num_l):
        sq = sq + jnp.square(hs[j] - mu_e)
    inv_e = jax.lax.rsqrt(jnp.sum(sq, axis=0, keepdims=True) / rows + BN_EPS) * ge_ref[...]
    att = None
    for j in range(num_l):
        hj = (hs[j] - mu_e) * inv_e + bte_ref[...]
        hj = jnp.where(hj >= 0.0, hj, LEAKY_SLOPE * hj)             # LeakyReLU(0.2)
        att = hj if att is None else jnp.maximum(att, hj)           # max over neighbours

    # ---- aggregate Conv1d (C4 -> C) with the sigmoid fused as epilogue ----
    a = jnp.dot(att.astype(bf16), wa_ref[...].astype(bf16),
                preferred_element_type=f32) + ba_ref[...]
    o_ref[...] = jax.nn.sigmoid(a)                       # (N*L, C)


def _full_spec(arr):
    nd = arr.ndim
    return pl.BlockSpec(arr.shape, lambda i, _nd=nd: (0,) * _nd)


def attention_head(xt_in, amat, gsel, p):
    """xt_in: (T, N*L*V, C) -> sigmoid(attention) as (N*L, C).  One pallas_call."""
    c = xt_in.shape[-1]
    nl = amat.shape[0]
    args = (xt_in, p["down_w"], p["down_b"], p["down_gamma"], p["down_beta"],
            amat, gsel, p["edge"]["w1"], p["edge"]["w2"],
            p["edge"]["gamma"], p["edge"]["beta"], p["agg_w"], p["agg_b"])
    return pl.pallas_call(
        _attention_head_kernel,
        out_shape=jax.ShapeDtypeStruct((nl, c), jnp.float32),
        grid=(1,),
        in_specs=[_full_spec(a) for a in args],
        out_specs=pl.BlockSpec((nl, c), lambda i: (0, 0)),
    )(*args)


# ------------------------- Pallas kernel 2: attention apply -----------------------------
def _attn_apply_kernel(x_ref, a_ref, o_ref):
    # x_ref: (1, C, L*P) lane-dense; a_ref: (1, C, L); o_ref: (1, C, P), P = T*V.
    p = o_ref.shape[2]
    num_l = a_ref.shape[2]
    a = a_ref[...]                                       # (1, C, L)
    acc = x_ref[:, :, 0:p] * a[:, :, 0:1]                # per-l loads, 128-aligned slices
    for l in range(1, num_l):
        acc = acc + x_ref[:, :, l * p:(l + 1) * p] * a[:, :, l:l + 1]
    o_ref[...] = acc                                     # unmasked full-lane store


def attn_apply(x, a_ncl):
    """out[n,c,t,v] = sum_l x[n,c,l,t,v] * a[n,c,l]; x stays in its native layout."""
    n, c, num_l, t, v = x.shape
    p = t * v
    out = pl.pallas_call(
        _attn_apply_kernel,
        out_shape=jax.ShapeDtypeStruct((n, c, p), jnp.float32),
        grid=(n,),
        in_specs=[pl.BlockSpec((1, c, num_l * p), lambda i: (i, 0, 0)),
                  pl.BlockSpec((1, c, num_l), lambda i: (i, 0, 0))],
        out_specs=pl.BlockSpec((1, c, p), lambda i: (i, 0, 0)),
        compiler_params=pltpu.CompilerParams(dimension_semantics=("parallel",)),
    )(x.reshape(n, c, num_l * p), a_ncl)
    return out.reshape(n, c, t, v)


# ------------------------- module forward ------------------------------------------------
def a_crhta_forward(x, p, k=3):
    """A_CRHTA.  x: (N, C, L, T, V) float32 (PyTorch layout) -> (N, C, T, V)."""
    n, c, num_l, t, v = x.shape
    if num_l != NUM_LAYERS:
        raise ValueError("L must equal the synthesized hierarchy depth")
    if k < num_l:
        # TODO(synk): k < num_layers needs the knn/top_k neighbour selection of the
        #             reference; with the module's k=3 >= L every point is a neighbour.
        raise NotImplementedError("fused EdgeConv path assumes k >= num_layers")

    # one boundary transpose so the in-kernel T-max lands matmul-ready: rows=(n,l,v), lanes=C
    xt_in = jnp.transpose(x, (3, 0, 2, 4, 1)).reshape(t, n * num_l * v, c)
    amat = build_avg_matrix(n, num_l, v, LAYERS)          # folded to constants at trace time
    gsel = build_neighbor_select(n, num_l)

    a_flat = attention_head(xt_in, amat, gsel, p)         # (N*L, C), sigmoid already applied
    a_ncl = jnp.transpose(a_flat.reshape(n, num_l, c), (0, 2, 1))   # tiny (N, C, L)
    return attn_apply(x, a_ncl)                           # (N, C, T, V), no output transpose


# ------------------------- deterministic parameters -------------------------------------
def make_params(key, in_channels):
    c4 = in_channels // 4
    keys = jax.random.split(key, 3)

    def w_init(kk, fan_in, fan_out):
        # kaiming_normal_(mode='fan_out') on a 1x1 conv weight, stored matmul-ready (Cin, Cout)
        std = math.sqrt(2.0 / fan_out)
        return std * jax.random.normal(kk, (fan_in, fan_out), jnp.float32)

    w_edge = w_init(keys[1], 2 * c4, c4)                  # Conv2d(2*C4 -> C4, bias=False)
    return {
        "down_w": w_init(keys[0], in_channels, c4),
        "down_b": jnp.zeros((1, c4), jnp.float32),
        "down_gamma": jnp.ones((1, c4), jnp.float32),
        "down_beta": jnp.zeros((1, c4), jnp.float32),
        "edge": {
            "w1": w_edge[:c4],                            # half applied to (neighbour - centre)
            "w2": w_edge[c4:],                            # half applied to the centre features
            "gamma": jnp.ones((1, c4), jnp.float32),      # bn_init(bn, 1)
            "beta": jnp.zeros((1, c4), jnp.float32),
        },
        "agg_w": w_init(keys[2], c4, in_channels),        # Conv1d(C4 -> C, k=1)
        "agg_b": jnp.zeros((1, in_channels), jnp.float32),
    }


# ------------------------- main ----------------------------------------------------------
if __name__ == "__main__":
    N, C, T, V = 2, 64, 8, 16
    L = NUM_LAYERS                      # hierarchy depth (num_layers) = 3
    key = jax.random.PRNGKey(0)
    kx, kp = jax.random.split(key)
    x = jax.random.normal(kx, (N, C, L, T, V), jnp.float32)
    params = make_params(kp, C)

    fwd = jax.jit(functools.partial(a_crhta_forward, p=params))
    out = fwd(x)
    jax.block_until_ready(out)
    assert out.shape == (N, C, T, V) and out.dtype == jnp.float32
    print("KERNEL_OK")
</pallas_src>

<mosaic_0001>
module attributes {stable_mosaic.version = 11 : i64} {
  func.func @_attention_head_kernel(%arg0: i32, %arg1: memref<8x96x64xf32, #tpu.memory_space<vmem>>, %arg2: memref<64x16xf32, #tpu.memory_space<vmem>>, %arg3: memref<1x16xf32, #tpu.memory_space<vmem>>, %arg4: memref<1x16xf32, #tpu.memory_space<vmem>>, %arg5: memref<1x16xf32, #tpu.memory_space<vmem>>, %arg6: memref<6x96xf32, #tpu.memory_space<vmem>>, %arg7: memref<3x6x6xf32, #tpu.memory_space<vmem>>, %arg8: memref<16x16xf32, #tpu.memory_space<vmem>>, %arg9: memref<16x16xf32, #tpu.memory_space<vmem>>, %arg10: memref<1x16xf32, #tpu.memory_space<vmem>>, %arg11: memref<1x16xf32, #tpu.memory_space<vmem>>, %arg12: memref<16x64xf32, #tpu.memory_space<vmem>>, %arg13: memref<1x64xf32, #tpu.memory_space<vmem>>, %arg14: memref<6x64xf32, #tpu.memory_space<vmem>>) attributes {dimension_semantics = [#tpu.dimension_semantics<arbitrary>], iteration_bounds = array<i64: 1>, scalar_prefetch = 0 : i64, scratch_operands = 0 : i64, tpu.core_type = #tpu.core_type<tc>, window_params = [{pipeline_mode = #tpu.pipeline_mode<synchronous>, transform_indices = @transform_0, window_bounds = array<i64: 8, 96, 64>}, {pipeline_mode = #tpu.pipeline_mode<synchronous>, transform_indices = @transform_1, window_bounds = array<i64: 64, 16>}, {pipeline_mode = #tpu.pipeline_mode<synchronous>, transform_indices = @transform_2, window_bounds = array<i64: 1, 16>}, {pipeline_mode = #tpu.pipeline_mode<synchronous>, transform_indices = @transform_3, window_bounds = array<i64: 1, 16>}, {pipeline_mode = #tpu.pipeline_mode<synchronous>, transform_indices = @transform_4, window_bounds = array<i64: 1, 16>}, {pipeline_mode = #tpu.pipeline_mode<synchronous>, transform_indices = @transform_5, window_bounds = array<i64: 6, 96>}, {pipeline_mode = #tpu.pipeline_mode<synchronous>, transform_indices = @transform_6, window_bounds = array<i64: 3, 6, 6>}, {pipeline_mode = #tpu.pipeline_mode<synchronous>, transform_indices = @transform_7, window_bounds = array<i64: 16, 16>}, {pipeline_mode = #tpu.pipeline_mode<synchronous>, transform_indices = @transform_8, window_bounds = array<i64: 16, 16>}, {pipeline_mode = #tpu.pipeline_mode<synchronous>, transform_indices = @transform_9, window_bounds = array<i64: 1, 16>}, {pipeline_mode = #tpu.pipeline_mode<synchronous>, transform_indices = @transform_10, window_bounds = array<i64: 1, 16>}, {pipeline_mode = #tpu.pipeline_mode<synchronous>, transform_indices = @transform_11, window_bounds = array<i64: 16, 64>}, {pipeline_mode = #tpu.pipeline_mode<synchronous>, transform_indices = @transform_12, window_bounds = array<i64: 1, 64>}, {pipeline_mode = #tpu.pipeline_mode<synchronous>, transform_indices = @transform_13, window_bounds = array<i64: 6, 64>}]} {
    %c0 = arith.constant 0 : index
    %c0_0 = arith.constant 0 : index
    %c0_1 = arith.constant 0 : index
    %0 = vector.load %arg1[%c0, %c0_0, %c0_1] : memref<8x96x64xf32, #tpu.memory_space<vmem>>, vector<1x96x64xf32>
    %1 = vector.shape_cast %0 : vector<1x96x64xf32> to vector<96x64xf32>
    %c1 = arith.constant 1 : index
    %c0_2 = arith.constant 0 : index
    %c0_3 = arith.constant 0 : index
    %2 = vector.load %arg1[%c1, %c0_2, %c0_3] : memref<8x96x64xf32, #tpu.memory_space<vmem>>, vector<1x96x64xf32>
    %3 = vector.shape_cast %2 : vector<1x96x64xf32> to vector<96x64xf32>
    %4 = arith.maximumf %1, %3 : vector<96x64xf32>
    %c2 = arith.constant 2 : index
    %c0_4 = arith.constant 0 : index
    %c0_5 = arith.constant 0 : index
    %5 = vector.load %arg1[%c2, %c0_4, %c0_5] : memref<8x96x64xf32, #tpu.memory_space<vmem>>, vector<1x96x64xf32>
    %6 = vector.shape_cast %5 : vector<1x96x64xf32> to vector<96x64xf32>
    %7 = arith.maximumf %4, %6 : vector<96x64xf32>
    %c3 = arith.constant 3 : index
    %c0_6 = arith.constant 0 : index
    %c0_7 = arith.constant 0 : index
    %8 = vector.load %arg1[%c3, %c0_6, %c0_7] : memref<8x96x64xf32, #tpu.memory_space<vmem>>, vector<1x96x64xf32>
    %9 = vector.shape_cast %8 : vector<1x96x64xf32> to vector<96x64xf32>
    %10 = arith.maximumf %7, %9 : vector<96x64xf32>
    %c4 = arith.constant 4 : index
    %c0_8 = arith.constant 0 : index
    %c0_9 = arith.constant 0 : index
    %11 = vector.load %arg1[%c4, %c0_8, %c0_9] : memref<8x96x64xf32, #tpu.memory_space<vmem>>, vector<1x96x64xf32>
    %12 = vector.shape_cast %11 : vector<1x96x64xf32> to vector<96x64xf32>
    %13 = arith.maximumf %10, %12 : vector<96x64xf32>
    %c5 = arith.constant 5 : index
    %c0_10 = arith.constant 0 : index
    %c0_11 = arith.constant 0 : index
    %14 = vector.load %arg1[%c5, %c0_10, %c0_11] : memref<8x96x64xf32, #tpu.memory_space<vmem>>, vector<1x96x64xf32>
    %15 = vector.shape_cast %14 : vector<1x96x64xf32> to vector<96x64xf32>
    %16 = arith.maximumf %13, %15 : vector<96x64xf32>
    %c6 = arith.constant 6 : index
    %c0_12 = arith.constant 0 : index
    %c0_13 = arith.constant 0 : index
    %17 = vector.load %arg1[%c6, %c0_12, %c0_13] : memref<8x96x64xf32, #tpu.memory_space<vmem>>, vector<1x96x64xf32>
    %18 = vector.shape_cast %17 : vector<1x96x64xf32> to vector<96x64xf32>
    %19 = arith.maximumf %16, %18 : vector<96x64xf32>
    %c7 = arith.constant 7 : index
    %c0_14 = arith.constant 0 : index
    %c0_15 = arith.constant 0 : index
    %20 = vector.load %arg1[%c7, %c0_14, %c0_15] : memref<8x96x64xf32, #tpu.memory_space<vmem>>, vector<1x96x64xf32>
    %21 = vector.shape_cast %20 : vector<1x96x64xf32> to vector<96x64xf32>
    %22 = arith.maximumf %19, %21 : vector<96x64xf32>
    %23 = arith.truncf %22 : vector<96x64xf32> to vector<96x64xbf16>
    %c0_16 = arith.constant 0 : index
    %c0_17 = arith.constant 0 : index
    %24 = vector.load %arg2[%c0_16, %c0_17] : memref<64x16xf32, #tpu.memory_space<vmem>>, vector<64x16xf32>
    %25 = arith.truncf %24 : vector<64x16xf32> to vector<64x16xbf16>
    %cst = arith.constant dense<0.000000e+00> : vector<96x16xf32>
    %26 = tpu.matmul %23, %25, %cst {dimension_numbers = #tpu.dot_dimension_numbers<[1], [0], [0], [1], [0, 0, 1, 1], [], []>} : vector<96x64xbf16>, vector<64x16xbf16>, vector<96x16xf32> -> vector<96x16xf32>
    %c0_18 = arith.constant 0 : index
    %c0_19 = arith.constant 0 : index
    %27 = vector.load %arg3[%c0_18, %c0_19] : memref<1x16xf32, #tpu.memory_space<vmem>>, vector<1x16xf32>
    %28 = vector.broadcast %27 : vector<1x16xf32> to vector<96x16xf32>
    %29 = arith.addf %26, %28 : vector<96x16xf32>
    %cst_20 = arith.constant dense<0.000000e+00> : vector<16xf32>
    %30 = vector.multi_reduction <add>, %29, %cst_20 [0] : vector<96x16xf32> to vector<16xf32>
    %31 = vector.shape_cast %30 : vector<16xf32> to vector<1x16xf32>
    %cst_21 = arith.constant 9.600000e+01 : f32
    %32 = vector.broadcast %cst_21 : f32 to vector<1x16xf32>
    %33 = arith.divf %31, %32 : vector<1x16xf32>
    %34 = vector.broadcast %33 : vector<1x16xf32> to vector<96x16xf32>
    %35 = arith.subf %29, %34 : vector<96x16xf32>
    %36 = arith.mulf %35, %35 : vector<96x16xf32>
    %cst_22 = arith.constant dense<0.000000e+00> : vector<16xf32>
    %37 = vector.multi_reduction <add>, %36, %cst_22 [0] : vector<96x16xf32> to vector<16xf32>
    %38 = vector.shape_cast %37 : vector<16xf32> to vector<1x16xf32>
    %cst_23 = arith.constant 9.600000e+01 : f32
    %39 = vector.broadcast %cst_23 : f32 to vector<1x16xf32>
    %40 = arith.divf %38, %39 : vector<1x16xf32>
    %41 = vector.broadcast %33 : vector<1x16xf32> to vector<96x16xf32>
    %42 = arith.subf %29, %41 : vector<96x16xf32>
    %cst_24 = arith.constant 9.99999974E-6 : f32
    %43 = vector.broadcast %cst_24 : f32 to vector<1x16xf32>
    %44 = arith.addf %40, %43 : vector<1x16xf32>
    %45 = math.rsqrt %44 : vector<1x16xf32>
    %46 = vector.broadcast %45 : vector<1x16xf32> to vector<96x16xf32>
    %47 = arith.mulf %42, %46 : vector<96x16xf32>
    %c0_25 = arith.constant 0 : index
    %c0_26 = arith.constant 0 : index
    %48 = vector.load %arg4[%c0_25, %c0_26] : memref<1x16xf32, #tpu.memory_space<vmem>>, vector<1x16xf32>
    %49 = vector.broadcast %48 : vector<1x16xf32> to vector<96x16xf32>
    %50 = arith.mulf %47, %49 : vector<96x16xf32>
    %c0_27 = arith.constant 0 : index
    %c0_28 = arith.constant 0 : index
    %51 = vector.load %arg5[%c0_27, %c0_28] : memref<1x16xf32, #tpu.memory_space<vmem>>, vector<1x16xf32>
    %52 = vector.broadcast %51 : vector<1x16xf32> to vector<96x16xf32>
    %53 = arith.addf %50, %52 : vector<96x16xf32>
    %cst_29 = arith.constant 0.000000e+00 : f32
    %54 = vector.broadcast %cst_29 : f32 to vector<96x16xf32>
    %55 = arith.maximumf %53, %54 : vector<96x16xf32>
    %c0_30 = arith.constant 0 : index
    %c0_31 = arith.constant 0 : index
    %56 = vector.load %arg6[%c0_30, %c0_31] : memref<6x96xf32, #tpu.memory_space<vmem>>, vector<6x96xf32>
    %cst_32 = arith.constant dense<0.000000e+00> : vector<6x16xf32>
    %57 = tpu.matmul %56, %55, %cst_32 {dimension_numbers = #tpu.dot_dimension_numbers<[1], [0], [0], [1], [0, 0, 1, 1], [], []>} : vector<6x96xf32>, vector<96x16xf32>, vector<6x16xf32> -> vector<6x16xf32>
    %58 = arith.truncf %57 : vector<6x16xf32> to vector<6x16xbf16>
    %c0_33 = arith.constant 0 : index
    %c0_34 = arith.constant 0 : index
    %59 = vector.load %arg8[%c0_33, %c0_34] : memref<16x16xf32, #tpu.memory_space<vmem>>, vector<16x16xf32>
    %60 = arith.truncf %59 : vector<16x16xf32> to vector<16x16xbf16>
    %cst_35 = arith.constant dense<0.000000e+00> : vector<6x16xf32>
    %61 = tpu.matmul %58, %60, %cst_35 {dimension_numbers = #tpu.dot_dimension_numbers<[1], [0], [0], [1], [0, 0, 1, 1], [], []>} : vector<6x16xbf16>, vector<16x16xbf16>, vector<6x16xf32> -> vector<6x16xf32>
    %62 = arith.truncf %57 : vector<6x16xf32> to vector<6x16xbf16>
    %c0_36 = arith.constant 0 : index
    %c0_37 = arith.constant 0 : index
    %63 = vector.load %arg9[%c0_36, %c0_37] : memref<16x16xf32, #tpu.memory_space<vmem>>, vector<16x16xf32>
    %64 = arith.truncf %63 : vector<16x16xf32> to vector<16x16xbf16>
    %cst_38 = arith.constant dense<0.000000e+00> : vector<6x16xf32>
    %65 = tpu.matmul %62, %64, %cst_38 {dimension_numbers = #tpu.dot_dimension_numbers<[1], [0], [0], [1], [0, 0, 1, 1], [], []>} : vector<6x16xbf16>, vector<16x16xbf16>, vector<6x16xf32> -> vector<6x16xf32>
    %c0_39 = arith.constant 0 : index
    %c0_40 = arith.constant 0 : index
    %c0_41 = arith.constant 0 : index
    %66 = vector.load %arg7[%c0_39, %c0_40, %c0_41] : memref<3x6x6xf32, #tpu.memory_space<vmem>>, vector<1x6x6xf32>
    %67 = vector.shape_cast %66 : vector<1x6x6xf32> to vector<6x6xf32>
    %cst_42 = arith.constant dense<0.000000e+00> : vector<6x16xf32>
    %68 = tpu.matmul %67, %61, %cst_42 {dimension_numbers = #tpu.dot_dimension_numbers<[1], [0], [0], [1], [0, 0, 1, 1], [], []>} : vector<6x6xf32>, vector<6x16xf32>, vector<6x16xf32> -> vector<6x16xf32>
    %69 = arith.subf %68, %61 : vector<6x16xf32>
    %70 = arith.addf %69, %65 : vector<6x16xf32>
    %c1_43 = arith.constant 1 : index
    %c0_44 = arith.constant 0 : index
    %c0_45 = arith.constant 0 : index
    %71 = vector.load %arg7[%c1_43, %c0_44, %c0_45] : memref<3x6x6xf32, #tpu.memory_space<vmem>>, vector<1x6x6xf32>
    %72 = vector.shape_cast %71 : vector<1x6x6xf32> to vector<6x6xf32>
    %cst_46 = arith.constant dense<0.000000e+00> : vector<6x16xf32>
    %73 = tpu.matmul %72, %61, %cst_46 {dimension_numbers = #tpu.dot_dimension_numbers<[1], [0], [0], [1], [0, 0, 1, 1], [], []>} : vector<6x6xf32>, vector<6x16xf32>, vector<6x16xf32> -> vector<6x16xf32>
    %74 = arith.subf %73, %61 : vector<6x16xf32>
    %75 = arith.addf %74, %65 : vector<6x16xf32>
    %c2_47 = arith.constant 2 : index
    %c0_48 = arith.constant 0 : index
    %c0_49 = arith.constant 0 : index
    %76 = vector.load %arg7[%c2_47, %c0_48, %c0_49] : memref<3x6x6xf32, #tpu.memory_space<vmem>>, vector<1x6x6xf32>
    %77 = vector.shape_cast %76 : vector<1x6x6xf32> to vector<6x6xf32>
    %cst_50 = arith.constant dense<0.000000e+00> : vector<6x16xf32>
    %78 = tpu.matmul %77, %61, %cst_50 {dimension_numbers = #tpu.dot_dimension_numbers<[1], [0], [0], [1], [0, 0, 1, 1], [], []>} : vector<6x6xf32>, vector<6x16xf32>, vector<6x16xf32> -> vector<6x16xf32>
    %79 = arith.subf %78, %61 : vector<6x16xf32>
    %80 = arith.addf %79, %65 : vector<6x16xf32>
    %81 = arith.addf %70, %75 : vector<6x16xf32>
    %82 = arith.addf %81, %80 : vector<6x16xf32>
    %cst_51 = arith.constant dense<0.000000e+00> : vector<16xf32>
    %83 = vector.multi_reduction <add>, %82, %cst_51 [0] : vector<6x16xf32> to vector<16xf32>
    %84 = vector.shape_cast %83 : vector<16xf32> to vector<1x16xf32>
    %cst_52 = arith.constant 1.800000e+01 : f32
    %85 = vector.broadcast %cst_52 : f32 to vector<1x16xf32>
    %86 = arith.divf %84, %85 : vector<1x16xf32>
    %87 = vector.broadcast %86 : vector<1x16xf32> to vector<6x16xf32>
    %88 = arith.subf %70, %87 : vector<6x16xf32>
    %89 = arith.mulf %88, %88 : vector<6x16xf32>
    %90 = vector.broadcast %86 : vector<1x16xf32> to vector<6x16xf32>
    %91 = arith.subf %75, %90 : vector<6x16xf32>
    %92 = arith.mulf %91, %91 : vector<6x16xf32>
    %93 = arith.addf %89, %92 : vector<6x16xf32>
    %94 = vector.broadcast %86 : vector<1x16xf32> to vector<6x16xf32>
    %95 = arith.subf %80, %94 : vector<6x16xf32>
    %96 = arith.mulf %95, %95 : vector<6x16xf32>
    %97 = arith.addf %93, %96 : vector<6x16xf32>
    %cst_53 = arith.constant dense<0.000000e+00> : vector<16xf32>
    %98 = vector.multi_reduction <add>, %97, %cst_53 [0] : vector<6x16xf32> to vector<16xf32>
    %99 = vector.shape_cast %98 : vector<16xf32> to vector<1x16xf32>
    %cst_54 = arith.constant 1.800000e+01 : f32
    %100 = vector.broadcast %cst_54 : f32 to vector<1x16xf32>
    %101 = arith.divf %99, %100 : vector<1x16xf32>
    %cst_55 = arith.constant 9.99999974E-6 : f32
    %102 = vector.broadcast %cst_55 : f32 to vector<1x16xf32>
    %103 = arith.addf %101, %102 : vector<1x16xf32>
    %104 = math.rsqrt %103 : vector<1x16xf32>
    %c0_56 = arith.constant 0 : index
    %c0_57 = arith.constant 0 : index
    %105 = vector.load %arg10[%c0_56, %c0_57] : memref<1x16xf32, #tpu.memory_space<vmem>>, vector<1x16xf32>
    %106 = arith.mulf %104, %105 : vector<1x16xf32>
    %107 = vector.broadcast %86 : vector<1x16xf32> to vector<6x16xf32>
    %108 = arith.subf %70, %107 : vector<6x16xf32>
    %109 = vector.broadcast %106 : vector<1x16xf32> to vector<6x16xf32>
    %110 = arith.mulf %108, %109 : vector<6x16xf32>
    %c0_58 = arith.constant 0 : index
    %c0_59 = arith.constant 0 : index
    %111 = vector.load %arg11[%c0_58, %c0_59] : memref<1x16xf32, #tpu.memory_space<vmem>>, vector<1x16xf32>
    %112 = vector.broadcast %111 : vector<1x16xf32> to vector<6x16xf32>
    %113 = arith.addf %110, %112 : vector<6x16xf32>
    %cst_60 = arith.constant 0.000000e+00 : f32
    %114 = vector.broadcast %cst_60 : f32 to vector<6x16xf32>
    %115 = arith.cmpf oge, %113, %114 : vector<6x16xf32>
    %cst_61 = arith.constant 2.000000e-01 : f32
    %116 = vector.broadcast %cst_61 : f32 to vector<6x16xf32>
    %117 = arith.mulf %116, %113 : vector<6x16xf32>
    %118 = arith.select %115, %113, %117 : vector<6x16xi1>, vector<6x16xf32>
    %119 = vector.broadcast %86 : vector<1x16xf32> to vector<6x16xf32>
    %120 = arith.subf %75, %119 : vector<6x16xf32>
    %121 = vector.broadcast %106 : vector<1x16xf32> to vector<6x16xf32>
    %122 = arith.mulf %120, %121 : vector<6x16xf32>
    %c0_62 = arith.constant 0 : index
    %c0_63 = arith.constant 0 : index
    %123 = vector.load %arg11[%c0_62, %c0_63] : memref<1x16xf32, #tpu.memory_space<vmem>>, vector<1x16xf32>
    %124 = vector.broadcast %123 : vector<1x16xf32> to vector<6x16xf32>
    %125 = arith.addf %122, %124 : vector<6x16xf32>
    %cst_64 = arith.constant 0.000000e+00 : f32
    %126 = vector.broadcast %cst_64 : f32 to vector<6x16xf32>
    %127 = arith.cmpf oge, %125, %126 : vector<6x16xf32>
    %cst_65 = arith.constant 2.000000e-01 : f32
    %128 = vector.broadcast %cst_65 : f32 to vector<6x16xf32>
    %129 = arith.mulf %128, %125 : vector<6x16xf32>
    %130 = arith.select %127, %125, %129 : vector<6x16xi1>, vector<6x16xf32>
    %131 = arith.maximumf %118, %130 : vector<6x16xf32>
    %132 = vector.broadcast %86 : vector<1x16xf32> to vector<6x16xf32>
    %133 = arith.subf %80, %132 : vector<6x16xf32>
    %134 = vector.broadcast %106 : vector<1x16xf32> to vector<6x16xf32>
    %135 = arith.mulf %133, %134 : vector<6x16xf32>
    %c0_66 = arith.constant 0 : index
    %c0_67 = arith.constant 0 : index
    %136 = vector.load %arg11[%c0_66, %c0_67] : memref<1x16xf32, #tpu.memory_space<vmem>>, vector<1x16xf32>
    %137 = vector.broadcast %136 : vector<1x16xf32> to vector<6x16xf32>
    %138 = arith.addf %135, %137 : vector<6x16xf32>
    %cst_68 = arith.constant 0.000000e+00 : f32
    %139 = vector.broadcast %cst_68 : f32 to vector<6x16xf32>
    %140 = arith.cmpf oge, %138, %139 : vector<6x16xf32>
    %cst_69 = arith.constant 2.000000e-01 : f32
    %141 = vector.broadcast %cst_69 : f32 to vector<6x16xf32>
    %142 = arith.mulf %141, %138 : vector<6x16xf32>
    %143 = arith.select %140, %138, %142 : vector<6x16xi1>, vector<6x16xf32>
    %144 = arith.maximumf %131, %143 : vector<6x16xf32>
    %145 = arith.truncf %144 : vector<6x16xf32> to vector<6x16xbf16>
    %c0_70 = arith.constant 0 : index
    %c0_71 = arith.constant 0 : index
    %146 = vector.load %arg12[%c0_70, %c0_71] : memref<16x64xf32, #tpu.memory_space<vmem>>, vector<16x64xf32>
    %147 = arith.truncf %146 : vector<16x64xf32> to vector<16x64xbf16>
    %cst_72 = arith.constant dense<0.000000e+00> : vector<6x64xf32>
    %148 = tpu.matmul %145, %147, %cst_72 {dimension_numbers = #tpu.dot_dimension_numbers<[1], [0], [0], [1], [0, 0, 1, 1], [], []>} : vector<6x16xbf16>, vector<16x64xbf16>, vector<6x64xf32> -> vector<6x64xf32>
    %c0_73 = arith.constant 0 : index
    %c0_74 = arith.constant 0 : index
    %149 = vector.load %arg13[%c0_73, %c0_74] : memref<1x64xf32, #tpu.memory_space<vmem>>, vector<1x64xf32>
    %150 = vector.broadcast %149 : vector<1x64xf32> to vector<6x64xf32>
    %151 = arith.addf %148, %150 : vector<6x64xf32>
    %152 = arith.negf %151 : vector<6x64xf32>
    %153 = math.exp %152 : vector<6x64xf32>
    %cst_75 = arith.constant 1.000000e+00 : f32
    %154 = vector.broadcast %cst_75 : f32 to vector<6x64xf32>
    %155 = arith.addf %154, %153 : vector<6x64xf32>
    %156 = arith.divf %154, %155 : vector<6x64xf32>
    %c0_76 = arith.constant 0 : index
    %c0_77 = arith.constant 0 : index
    %157 = vector.load %arg14[%c0_76, %c0_77] : memref<6x64xf32, #tpu.memory_space<vmem>>, vector<6x64xf32>
    tpu.vector_store %arg14[%c0_76, %c0_77], %156 {strides = array<i32>} : memref<6x64xf32, #tpu.memory_space<vmem>>, vector<6x64xf32>,
    return
  }
  func.func @transform_0(%arg0: i32) -> (i32, i32, i32) {
    %c0_i32 = arith.constant 0 : i32
    %c0_i32_0 = arith.constant 0 : i32
    %c0_i32_1 = arith.constant 0 : i32
    %c0_i32_2 = arith.constant 0 : i32
    return %c0_i32, %c0_i32_0, %c0_i32_1 : i32, i32, i32
  }
  func.func @transform_1(%arg0: i32) -> (i32, i32) {
    %c0_i32 = arith.constant 0 : i32
    %c0_i32_0 = arith.constant 0 : i32
    %c0_i32_1 = arith.constant 0 : i32
    return %c0_i32, %c0_i32_0 : i32, i32
  }
  func.func @transform_2(%arg0: i32) -> (i32, i32) {
    %c0_i32 = arith.constant 0 : i32
    %c0_i32_0 = arith.constant 0 : i32
    %c0_i32_1 = arith.constant 0 : i32
    return %c0_i32, %c0_i32_0 : i32, i32
  }
  func.func @transform_3(%arg0: i32) -> (i32, i32) {
    %c0_i32 = arith.constant 0 : i32
    %c0_i32_0 = arith.constant 0 : i32
    %c0_i32_1 = arith.constant 0 : i32
    return %c0_i32, %c0_i32_0 : i32, i32
  }
  func.func @transform_4(%arg0: i32) -> (i32, i32) {
    %c0_i32 = arith.constant 0 : i32
    %c0_i32_0 = arith.constant 0 : i32
    %c0_i32_1 = arith.constant 0 : i32
    return %c0_i32, %c0_i32_0 : i32, i32
  }
  func.func @transform_5(%arg0: i32) -> (i32, i32) {
    %c0_i32 = arith.constant 0 : i32
    %c0_i32_0 = arith.constant 0 : i32
    %c0_i32_1 = arith.constant 0 : i32
    return %c0_i32, %c0_i32_0 : i32, i32
  }
  func.func @transform_6(%arg0: i32) -> (i32, i32, i32) {
    %c0_i32 = arith.constant 0 : i32
    %c0_i32_0 = arith.constant 0 : i32
    %c0_i32_1 = arith.constant 0 : i32
    %c0_i32_2 = arith.constant 0 : i32
    return %c0_i32, %c0_i32_0, %c0_i32_1 : i32, i32, i32
  }
  func.func @transform_7(%arg0: i32) -> (i32, i32) {
    %c0_i32 = arith.constant 0 : i32
    %c0_i32_0 = arith.constant 0 : i32
    %c0_i32_1 = arith.constant 0 : i32
    return %c0_i32, %c0_i32_0 : i32, i32
  }
  func.func @transform_8(%arg0: i32) -> (i32, i32) {
    %c0_i32 = arith.constant 0 : i32
    %c0_i32_0 = arith.constant 0 : i32
    %c0_i32_1 = arith.constant 0 : i32
    return %c0_i32, %c0_i32_0 : i32, i32
  }
  func.func @transform_9(%arg0: i32) -> (i32, i32) {
    %c0_i32 = arith.constant 0 : i32
    %c0_i32_0 = arith.constant 0 : i32
    %c0_i32_1 = arith.constant 0 : i32
    return %c0_i32, %c0_i32_0 : i32, i32
  }
  func.func @transform_10(%arg0: i32) -> (i32, i32) {
    %c0_i32 = arith.constant 0 : i32
    %c0_i32_0 = arith.constant 0 : i32
    %c0_i32_1 = arith.constant 0 : i32
    return %c0_i32, %c0_i32_0 : i32, i32
  }
  func.func @transform_11(%arg0: i32) -> (i32, i32) {
    %c0_i32 = arith.constant 0 : i32
    %c0_i32_0 = arith.constant 0 : i32
    %c0_i32_1 = arith.constant 0 : i32
    return %c0_i32, %c0_i32_0 : i32, i32
  }
  func.func @transform_12(%arg0: i32) -> (i32, i32) {
    %c0_i32 = arith.constant 0 : i32
    %c0_i32_0 = arith.constant 0 : i32
    %c0_i32_1 = arith.constant 0 : i32
    return %c0_i32, %c0_i32_0 : i32, i32
  }
  func.func @transform_13(%arg0: i32) -> (i32, i32) {
    %c0_i32 = arith.constant 0 : i32
    %c0_i32_0 = arith.constant 0 : i32
    %c0_i32_1 = arith.constant 0 : i32
    return %c0_i32, %c0_i32_0 : i32, i32
  }
}

module attributes {stable_mosaic.version = 11 : i64} {
  func.func @_attn_apply_kernel(%arg0: i32, %arg1: memref<1x64x384xf32, #tpu.memory_space<vmem>>, %arg2: memref<1x64x3xf32, #tpu.memory_space<vmem>>, %arg3: memref<1x64x128xf32, #tpu.memory_space<vmem>>) attributes {dimension_semantics = [#tpu.dimension_semantics<parallel>], iteration_bounds = array<i64: 2>, scalar_prefetch = 0 : i64, scratch_operands = 0 : i64, tpu.core_type = #tpu.core_type<tc>, window_params = [{transform_indices = @transform_0, window_bounds = array<i64: 1, 64, 384>}, {transform_indices = @transform_1, window_bounds = array<i64: 1, 64, 3>}, {transform_indices = @transform_2, window_bounds = array<i64: 1, 64, 128>}]} {
    %c0 = arith.constant 0 : index
    %c0_0 = arith.constant 0 : index
    %c0_1 = arith.constant 0 : index
    %0 = vector.load %arg2[%c0, %c0_0, %c0_1] : memref<1x64x3xf32, #tpu.memory_space<vmem>>, vector<1x64x3xf32>
    %c0_2 = arith.constant 0 : index
    %c0_3 = arith.constant 0 : index
    %c0_4 = arith.constant 0 : index
    %1 = vector.load %arg1[%c0_2, %c0_3, %c0_4] : memref<1x64x384xf32, #tpu.memory_space<vmem>>, vector<1x64x128xf32>
    %2 = vector.extract_strided_slice %0 {offsets = [0, 0, 0], sizes = [1, 64, 1], strides = [1, 1, 1]} : vector<1x64x3xf32> to vector<1x64x1xf32>
    %3 = vector.broadcast %2 : vector<1x64x1xf32> to vector<1x64x128xf32>
    %4 = arith.mulf %1, %3 : vector<1x64x128xf32>
    %c0_5 = arith.constant 0 : index
    %c0_6 = arith.constant 0 : index
    %c128 = arith.constant 128 : index
    %5 = vector.load %arg1[%c0_5, %c0_6, %c128] : memref<1x64x384xf32, #tpu.memory_space<vmem>>, vector<1x64x128xf32>
    %6 = vector.extract_strided_slice %0 {offsets = [0, 0, 1], sizes = [1, 64, 1], strides = [1, 1, 1]} : vector<1x64x3xf32> to vector<1x64x1xf32>
    %7 = vector.broadcast %6 : vector<1x64x1xf32> to vector<1x64x128xf32>
    %8 = arith.mulf %5, %7 : vector<1x64x128xf32>
    %9 = arith.addf %4, %8 : vector<1x64x128xf32>
    %c0_7 = arith.constant 0 : index
    %c0_8 = arith.constant 0 : index
    %c256 = arith.constant 256 : index
    %10 = vector.load %arg1[%c0_7, %c0_8, %c256] : memref<1x64x384xf32, #tpu.memory_space<vmem>>, vector<1x64x128xf32>
    %11 = vector.extract_strided_slice %0 {offsets = [0, 0, 2], sizes = [1, 64, 1], strides = [1, 1, 1]} : vector<1x64x3xf32> to vector<1x64x1xf32>
    %12 = vector.broadcast %11 : vector<1x64x1xf32> to vector<1x64x128xf32>
    %13 = arith.mulf %10, %12 : vector<1x64x128xf32>
    %14 = arith.addf %9, %13 : vector<1x64x128xf32>
    %c0_9 = arith.constant 0 : index
    %c0_10 = arith.constant 0 : index
    %c0_11 = arith.constant 0 : index
    %15 = vector.load %arg3[%c0_9, %c0_10, %c0_11] : memref<1x64x128xf32, #tpu.memory_space<vmem>>, vector<1x64x128xf32>
    tpu.vector_store %arg3[%c0_9, %c0_10, %c0_11], %14 {strides = array<i32>} : memref<1x64x128xf32, #tpu.memory_space<vmem>>, vector<1x64x128xf32>,
    return
  }
  func.func @transform_0(%arg0: i32) -> (i32, i32, i32) {
    %c0_i32 = arith.constant 0 : i32
    %c0_i32_0 = arith.constant 0 : i32
    %c0_i32_1 = arith.constant 0 : i32
    return %arg0, %c0_i32, %c0_i32_0 : i32, i32, i32
  }
  func.func @transform_1(%arg0: i32) -> (i32, i32, i32) {
    %c0_i32 = arith.constant 0 : i32
    %c0_i32_0 = arith.constant 0 : i32
    %c0_i32_1 = arith.constant 0 : i32
    return %arg0, %c0_i32, %c0_i32_0 : i32, i32, i32
  }
  func.func @transform_2(%arg0: i32) -> (i32, i32, i32) {
    %c0_i32 = arith.constant 0 : i32
    %c0_i32_0 = arith.constant 0 : i32
    %c0_i32_1 = arith.constant 0 : i32
    return %arg0, %c0_i32, %c0_i32_0 : i32, i32, i32
  }
}

</mosaic_0001>

<bundles_post_ra>
// kernel: a_crhta_forward.2
= control target key start
LH: loop header
LB: loop body
LE: loop exit
PB: predicated region body
PF: predicated region fallthrough
CT: control target
= control target key end

     0   :  { %vm257_vm0 = vcmask 523264   ;;  %vm357_vm1 = vcmask 130048   ;;  %vm1286_vm2 = vmmov 0   ;;  %vm508_vm3 = vcmask 785408   ;;  %s1805_s1 = inlined_call_operand.vmem [shape: f32[64,16], index: 1, kind: input, shape index: {}]   ;;  %s1806_s0 = inlined_call_operand.vmem [shape: f32[8,96,64], index: 0, kind: input, shape index: {}]   ;;  %s1807_s2 = inlined_call_operand.vmem [shape: f32[1,16], index: 2, kind: input, shape index: {}, may-alias: {2,4,10}]   ;;  %s1808_s3 = inlined_call_operand.vmem [shape: f32[1,16], index: 3, kind: input, shape index: {}, may-alias: {3,9}]   ;;  %s1809_s4 = inlined_call_operand.vmem [shape: f32[1,16], index: 4, kind: input, shape index: {}, may-alias: {2,4,10}]   ;;  %s1810_s5 = inlined_call_operand.vmem [shape: f32[6,96], index: 5, kind: input, shape index: {}]   ;;  %s1811_s7 = inlined_call_operand.vmem [shape: f32[16,16], index: 7, kind: input, shape index: {}]   ;;  %s1812_s8 = inlined_call_operand.vmem [shape: f32[16,16], index: 8, kind: input, shape index: {}]   ;;  %s1813_s6 = inlined_call_operand.vmem [shape: f32[3,6,6], index: 6, kind: input, shape index: {}]   ;;  %s1814_s11 = inlined_call_operand.vmem [shape: f32[16,64], index: 11, kind: input, shape index: {}]   ;;  %s1815_s9 = inlined_call_operand.vmem [shape: f32[1,16], index: 9, kind: input, shape index: {}, may-alias: {3,9}]   ;;  %s1816_s10 = inlined_call_operand.vmem [shape: f32[1,16], index: 10, kind: input, shape index: {}, may-alias: {2,4,10}]   ;;  %s1817_s12 = inlined_call_operand.vmem [shape: f32[1,64], index: 12, kind: input, shape index: {}]   ;;  %s1818_s13 = inlined_call_operand.vmem [shape: f32[6,64], index: 13, kind: output, shape index: {}]  }
   0x1   :  { %v238_v0 = vld [vmem:[%s1805_s1] sm:$0xff]  ;;  %v239_v1 = vld [vmem:[%s1805_s1 + $0x8] sm:$0xff]  ;;  %v240_v2 = vld [vmem:[%s1805_s1 + $0x10] sm:$0xff]  ;;  %vm677_vm4 = vcmask 1045504   ;;  %vm673_vm5 = vcmask 48128   ;;  %vm909_vm6 = vcmask 128000  }
   0x2   :  { %v246_v3 = vpack.c.bf16 %v239_v1, %v238_v0  ;;  %v241_v4 = vld [vmem:[%s1805_s1 + $0x18] sm:$0xff]  ;;  %v242_v6 = vld [vmem:[%s1805_s1 + $0x20] sm:$0xff]  ;;  %v243_v7 = vld [vmem:[%s1805_s1 + $0x28] sm:$0xff]  ;;  %vm1027_vm10 = vcmask 521216  }
   0x3   :  { %v247_v5 = vpack.c.bf16 %v241_v4, %v240_v2  ;;  %v45_v8 = vld [vmem:[%s1806_s0] sm:$0xff]  ;;  %v46_v9 = vld [vmem:[%s1806_s0 + $0x8] sm:$0xff]  ;;  %v248_v16 = vpack.c.bf16 %v243_v7, %v242_v6  ;;  %v244_v19 = vld [vmem:[%s1805_s1 + $0x30] sm:$0xff] }
   0x4   :  { %1176 = vmatprep.subr.bf16.mxu0 %v246_v3  ;;  %v1033_v10 = vld [vmem:[%s1806_s0 + $0x60] sm:$0xff]  ;;  %v1034_v11 = vld [vmem:[%s1806_s0 + $0x68] sm:$0xff]  ;;  %v245_v20 = vld [vmem:[%s1805_s1 + $0x38] sm:$0xff] }
   0x5   :  { %1177 = vmatpush3.bf16.msra.mxu0 %v246_v3  ;;  %v70_v12 = vmax.f32 %v45_v8, %v1033_v10  ;;  %v71_v13 = vmax.f32 %v46_v9, %v1034_v11  ;;  %v1045_v14 = vld [vmem:[%s1806_s0 + $0xc0] sm:$0xff]  ;;  %v1046_v15 = vld [vmem:[%s1806_s0 + $0xc8] sm:$0xff]  ;;  %v47_v29 = vld [vmem:[%s1806_s0 + $0x10] sm:$0xff]  ;;  %v249_v32 = vpack.c.bf16 %v245_v20, %v244_v19 }
   0x6   :  { %1178 = vmatprep.subr.bf16.mxu0 %v247_v5  ;;  %v1057_v17 = vld [vmem:[%s1806_s0 + $0x120] sm:$0xff]  ;;  %v1058_v18 = vld [vmem:[%s1806_s0 + $0x128] sm:$0xff]  ;;  %v48_v30 = vld [vmem:[%s1806_s0 + $0x18] sm:$0xff] }
   0x7   :  { %v95_v21 = vmax.f32 %v70_v12, %v1045_v14  ;;  %v96_v22 = vmax.f32 %v71_v13, %v1046_v15  ;;  %v1069_v23 = vld [vmem:[%s1806_s0 + $0x180] sm:$0xff]  ;;  %v1070_v24 = vld [vmem:[%s1806_s0 + $0x188] sm:$0xff]  ;;  %v1035_v31 = vld [vmem:[%s1806_s0 + $0x70] sm:$0xff] }
   0x8   :  { %v1081_v25 = vld [vmem:[%s1806_s0 + $0x1e0] sm:$0xff]  ;;  %v1082_v26 = vld [vmem:[%s1806_s0 + $0x1e8] sm:$0xff]  ;;  %v1036_v33 = vld [vmem:[%s1806_s0 + $0x78] sm:$0xff]  ;;  %v72_v34 = vmax.f32 %v47_v29, %v1035_v31 }
   0x9   :  { %1179 = vmatpush3.bf16.msra.mxu0 %v247_v5  ;;  %v120_v27 = vmax.f32 %v95_v21, %v1057_v17  ;;  %v121_v28 = vmax.f32 %v96_v22, %v1058_v18  ;;  %v1047_v35 = vld [vmem:[%s1806_s0 + $0xd0] sm:$0xff]  ;;  %v1048_v36 = vld [vmem:[%s1806_s0 + $0xd8] sm:$0xff]  ;;  %v1093_v39 = vld [vmem:[%s1806_s0 + $0x240] sm:$0xff]  ;;  %v73_v41 = vmax.f32 %v48_v30, %v1036_v33 }
   0xa   :  { %1180 = vmatprep.subr.bf16.mxu0 %v248_v16  ;;  %v1094_v40 = vld [vmem:[%s1806_s0 + $0x248] sm:$0xff]  ;;  %v1059_v42 = vld [vmem:[%s1806_s0 + $0x130] sm:$0xff]  ;;  %v1105_v43 = vld [vmem:[%s1806_s0 + $0x2a0] sm:$0xff]  ;;  %v97_v45 = vmax.f32 %v72_v34, %v1047_v35 }
   0xb   :  { %v145_v37 = vmax.f32 %v120_v27, %v1069_v23  ;;  %v146_v38 = vmax.f32 %v121_v28, %v1070_v24  ;;  %v1106_v44 = vld [vmem:[%s1806_s0 + $0x2a8] sm:$0xff]  ;;  %v1060_v46 = vld [vmem:[%s1806_s0 + $0x138] sm:$0xff]  ;;  %v98_v49 = vmax.f32 %v73_v41, %v1048_v36  ;;  %v1071_v50 = vld [vmem:[%s1806_s0 + $0x190] sm:$0xff] }
   0xc   :  { %v1072_v51 = vld [vmem:[%s1806_s0 + $0x198] sm:$0xff]  ;;  %v1083_v52 = vld [vmem:[%s1806_s0 + $0x1f0] sm:$0xff]  ;;  %v122_v53 = vmax.f32 %v97_v45, %v1059_v42  ;;  %v49_v55 = vld [vmem:[%s1806_s0 + $0x20] sm:$0xff] }
   0xd   :  { %1181 = vmatpush3.bf16.msra.mxu0 %v248_v16  ;;  %v170_v47 = vmax.f32 %v145_v37, %v1081_v25  ;;  %v171_v48 = vmax.f32 %v146_v38, %v1082_v26  ;;  %v1084_v54 = vld [vmem:[%s1806_s0 + $0x1f8] sm:$0xff]  ;;  %v50_v56 = vld [vmem:[%s1806_s0 + $0x28] sm:$0xff]  ;;  %v123_v59 = vmax.f32 %v98_v49, %v1060_v46  ;;  %v1037_v60 = vld [vmem:[%s1806_s0 + $0x80] sm:$0xff] }
   0xe   :  { %1182 = vmatprep.subr.bf16.mxu0 %v249_v32  ;;  %v1038_v61 = vld [vmem:[%s1806_s0 + $0x88] sm:$0xff]  ;;  %v1049_v62 = vld [vmem:[%s1806_s0 + $0xe0] sm:$0xff]  ;;  %v147_v63 = vmax.f32 %v122_v53, %v1071_v50  ;;  %v1095_v0 = vld [vmem:[%s1806_s0 + $0x250] sm:$0xff]  ;;  %v74_v2 = vmax.f32 %v49_v55, %v1037_v60 }
   0xf   :  { %v195_v57 = vmax.f32 %v170_v47, %v1093_v39  ;;  %v196_v58 = vmax.f32 %v171_v48, %v1094_v40  ;;  %v1096_v1 = vld [vmem:[%s1806_s0 + $0x258] sm:$0xff]  ;;  %v75_v3 = vmax.f32 %v50_v56, %v1038_v61  ;;  %v1050_v4 = vld [vmem:[%s1806_s0 + $0xe8] sm:$0xff]  ;;  %v148_v7 = vmax.f32 %v123_v59, %v1072_v51  ;;  %v1107_v8 = vld [vmem:[%s1806_s0 + $0x2b0] sm:$0xff] }
  0x10   :  { %v1061_v9 = vld [vmem:[%s1806_s0 + $0x140] sm:$0xff]  ;;  %v1062_v10 = vld [vmem:[%s1806_s0 + $0x148] sm:$0xff]  ;;  %v172_v11 = vmax.f32 %v147_v63, %v1083_v52  ;;  %v1108_v12 = vld [vmem:[%s1806_s0 + $0x2b8] sm:$0xff]  ;;  %v99_v13 = vmax.f32 %v74_v2, %v1049_v62 }
  0x11   :  { %1183 = vmatpush3.bf16.msra.mxu0 %v249_v32  ;;  %v220_v5 = vmax.f32 %v195_v57, %v1105_v43  ;;  %v221_v6 = vmax.f32 %v196_v58, %v1106_v44  ;;  %v100_v14 = vmax.f32 %v75_v3, %v1050_v4  ;;  %v1073_v15 = vld [vmem:[%s1806_s0 + $0x1a0] sm:$0xff]  ;;  %v1074_v16 = vld [vmem:[%s1806_s0 + $0x1a8] sm:$0xff]  ;;  %v173_v18 = vmax.f32 %v148_v7, %v1084_v54  ;;  %v51_v21 = vld [vmem:[%s1806_s0 + $0x30] sm:$0xff] }
  0x12   :  { %v1085_v19 = vld [vmem:[%s1806_s0 + $0x200] sm:$0xff]  ;;  %v1086_v20 = vld [vmem:[%s1806_s0 + $0x208] sm:$0xff]  ;;  %v197_v22 = vmax.f32 %v172_v11, %v1095_v0  ;;  %v124_v23 = vmax.f32 %v99_v13, %v1061_v9  ;;  %v52_v25 = vld [vmem:[%s1806_s0 + $0x38] sm:$0xff] }
  0x13   :  { %v232_v17 = vpack.c.bf16 %v221_v6, %v220_v5  ;;  %v125_v24 = vmax.f32 %v100_v14, %v1062_v10  ;;  %v1039_v26 = vld [vmem:[%s1806_s0 + $0x90] sm:$0xff]  ;;  %v1040_v27 = vld [vmem:[%s1806_s0 + $0x98] sm:$0xff]  ;;  %v198_v28 = vmax.f32 %v173_v18, %v1096_v1  ;;  %v1097_v29 = vld [vmem:[%s1806_s0 + $0x260] sm:$0xff] }
  0x14   :  { %v76_v30 = vmax.f32 %v51_v21, %v1039_v26  ;;  %v77_v31 = vmax.f32 %v52_v25, %v1040_v27  ;;  %v1051_v32 = vld [vmem:[%s1806_s0 + $0xf0] sm:$0xff]  ;;  %v1052_v33 = vld [vmem:[%s1806_s0 + $0xf8] sm:$0xff]  ;;  %v222_v34 = vmax.f32 %v197_v22, %v1107_v8  ;;  %v149_v35 = vmax.f32 %v124_v23, %v1073_v15  ;;  %v1098_v37 = vld [vmem:[%s1806_s0 + $0x268] sm:$0xff] }
  0x15   :  { %1184 = vmatprep.mubr.msk.bf16.mxu0 %vm257_vm0, %v232_v17  ;;  %v150_v36 = vmax.f32 %v125_v24, %v1074_v16  ;;  %v1063_v38 = vld [vmem:[%s1806_s0 + $0x150] sm:$0xff]  ;;  %v1064_v39 = vld [vmem:[%s1806_s0 + $0x158] sm:$0xff]  ;;  %v223_v40 = vmax.f32 %v198_v28, %v1108_v12  ;;  %v1109_v41 = vld [vmem:[%s1806_s0 + $0x2c0] sm:$0xff] }
  0x16   :  { %v1110_v42 = vld [vmem:[%s1806_s0 + $0x2c8] sm:$0xff]  ;;  %v101_v43 = vmax.f32 %v76_v30, %v1051_v32  ;;  %v102_v44 = vmax.f32 %v77_v31, %v1052_v33  ;;  %v1075_v45 = vld [vmem:[%s1806_s0 + $0x1b0] sm:$0xff]  ;;  %v174_v46 = vmax.f32 %v149_v35, %v1085_v19  ;;  %v1076_v48 = vld [vmem:[%s1806_s0 + $0x1b8] sm:$0xff] }
  0x17   :  { %v175_v47 = vmax.f32 %v150_v36, %v1086_v20  ;;  %v1087_v49 = vld [vmem:[%s1806_s0 + $0x210] sm:$0xff]  ;;  %v1088_v50 = vld [vmem:[%s1806_s0 + $0x218] sm:$0xff]  ;;  %v233_v51 = vpack.c.bf16 %v223_v40, %v222_v34  ;;  %v53_v54 = vld [vmem:[%s1806_s0 + $0x40] sm:$0xff] }
  0x18   :  { %v126_v52 = vmax.f32 %v101_v43, %v1063_v38  ;;  %v127_v53 = vmax.f32 %v102_v44, %v1064_v39  ;;  %v54_v55 = vld [vmem:[%s1806_s0 + $0x48] sm:$0xff]  ;;  %v1041_v56 = vld [vmem:[%s1806_s0 + $0xa0] sm:$0xff]  ;;  %v199_v57 = vmax.f32 %v174_v46, %v1097_v29  ;;  %v1099_v1 = vld [vmem:[%s1806_s0 + $0x270] sm:$0xff] }
  0x19   :  { %v200_v58 = vmax.f32 %v175_v47, %v1098_v37  ;;  %v1042_v59 = vld [vmem:[%s1806_s0 + $0xa8] sm:$0xff]  ;;  %v78_v60 = vmax.f32 %v53_v54, %v1041_v56  ;;  %v1053_v61 = vld [vmem:[%s1806_s0 + $0x100] sm:$0xff]  ;;  %1185 = vmatmul.mubr.msk.bf16.vlgmr.msra.gmra.mrb[0].mxu0 %vm257_vm0, %v233_v51  ;;  %v1100_v6 = vld [vmem:[%s1806_s0 + $0x278] sm:$0xff] }
  0x1a   :  { %v1054_v62 = vld [vmem:[%s1806_s0 + $0x108] sm:$0xff]  ;;  %v151_v63 = vmax.f32 %v126_v52, %v1075_v45  ;;  %v152_v0 = vmax.f32 %v127_v53, %v1076_v48  ;;  %v79_v2 = vmax.f32 %v54_v55, %v1042_v59  ;;  %v1065_v3 = vld [vmem:[%s1806_s0 + $0x160] sm:$0xff]  ;;  %v224_v4 = vmax.f32 %v199_v57, %v1109_v41  ;;  %v1111_v7 = vld [vmem:[%s1806_s0 + $0x2d0] sm:$0xff] }
  0x1b   :  { %v225_v5 = vmax.f32 %v200_v58, %v1110_v42  ;;  %v103_v8 = vmax.f32 %v78_v60, %v1053_v61  ;;  %v1066_v9 = vld [vmem:[%s1806_s0 + $0x168] sm:$0xff]  ;;  %v1112_v12 = vld [vmem:[%s1806_s0 + $0x2d8] sm:$0xff]  ;;  %v1077_v14 = vld [vmem:[%s1806_s0 + $0x1c0] sm:$0xff] }
  0x1c   :  { %v176_v10 = vmax.f32 %v151_v63, %v1087_v49  ;;  %v177_v11 = vmax.f32 %v152_v0, %v1088_v50  ;;  %v104_v13 = vmax.f32 %v79_v2, %v1054_v62  ;;  %v1078_v15 = vld [vmem:[%s1806_s0 + $0x1c8] sm:$0xff]  ;;  %v1089_v18 = vld [vmem:[%s1806_s0 + $0x220] sm:$0xff]  ;;  %v55_v19 = vld [vmem:[%s1806_s0 + $0x50] sm:$0xff] }
  0x1d   :  { %v234_v16 = vpack.c.bf16 %v225_v5, %v224_v4  ;;  %v128_v17 = vmax.f32 %v103_v8, %v1065_v3  ;;  %v56_v20 = vld [vmem:[%s1806_s0 + $0x58] sm:$0xff]  ;;  %v1043_v24 = vld [vmem:[%s1806_s0 + $0xb0] sm:$0xff]  ;;  %v1090_v28 = vld [vmem:[%s1806_s0 + $0x228] sm:$0xff] }
  0x1e   :  { %v201_v21 = vmax.f32 %v176_v10, %v1099_v1  ;;  %v202_v22 = vmax.f32 %v177_v11, %v1100_v6  ;;  %v129_v23 = vmax.f32 %v104_v13, %v1066_v9  ;;  %v1044_v25 = vld [vmem:[%s1806_s0 + $0xb8] sm:$0xff]  ;;  %v1055_v26 = vld [vmem:[%s1806_s0 + $0x110] sm:$0xff]  ;;  %v80_v29 = vmax.f32 %v55_v19, %v1043_v24  ;;  %v1101_v35 = vld [vmem:[%s1806_s0 + $0x280] sm:$0xff] }
  0x1f   :  { %1188 = vmatprep.mubr.msk.bf16.mxu0 %vm257_vm0, %v234_v16  ;;  %v153_v27 = vmax.f32 %v128_v17, %v1077_v14  ;;  %v81_v30 = vmax.f32 %v56_v20, %v1044_v25  ;;  %v1056_v31 = vld [vmem:[%s1806_s0 + $0x118] sm:$0xff]  ;;  %v1067_v36 = vld [vmem:[%s1806_s0 + $0x170] sm:$0xff]  ;;  %v1102_v39 = vld [vmem:[%s1806_s0 + $0x288] sm:$0xff]  ;;  %v1285_v6 = vmov 0.0|0.0   ;;  %v1287_v19 = vmov 0.0  }
  0x20   :  { %v226_v32 = vmax.f32 %v201_v21, %v1111_v7  ;;  %v227_v33 = vmax.f32 %v202_v22, %v1112_v12  ;;  %v154_v34 = vmax.f32 %v129_v23, %v1078_v15  ;;  %v1068_v37 = vld [vmem:[%s1806_s0 + $0x178] sm:$0xff]  ;;  %v105_v40 = vmax.f32 %v80_v29, %v1055_v26  ;;  %v1113_v44 = vld [vmem:[%s1806_s0 + $0x2e0] sm:$0xff]  ;;  %v1079_v45 = vld [vmem:[%s1806_s0 + $0x1d0] sm:$0xff]  ;;  %1256 = vmatprep.subr.bf16.mxu1 %v1285_v6 }
  0x21   :  { %v178_v38 = vmax.f32 %v153_v27, %v1089_v18  ;;  %v106_v41 = vmax.f32 %v81_v30, %v1056_v31  ;;  %v1080_v46 = vld [vmem:[%s1806_s0 + $0x1d8] sm:$0xff]  ;;  %v1114_v48 = vld [vmem:[%s1806_s0 + $0x2e8] sm:$0xff]  ;;  %v1091_v52 = vld [vmem:[%s1806_s0 + $0x230] sm:$0xff]  ;;  %1220 = vmatprep.mubr.msk.f32.mxu1 %vm1286_vm2, %v1287_v19  ;;  %1240 = vmatprep.subr.mxu0 %v1287_v19 }
  0x22   :  { %v235_v42 = vpack.c.bf16 %v227_v33, %v226_v32  ;;  %v179_v43 = vmax.f32 %v154_v34, %v1090_v28  ;;  %v130_v49 = vmax.f32 %v105_v40, %v1067_v36  ;;  %v1092_v53 = vld [vmem:[%s1806_s0 + $0x238] sm:$0xff]  ;;  %v1103_v58 = vld [vmem:[%s1806_s0 + $0x290] sm:$0xff]  ;;  %v1117_v7 = vld [vmem:[%s1807_s2] ss:$0 sm:$0xff] }
  0x23   :  { %v203_v47 = vmax.f32 %v178_v38, %v1101_v35  ;;  %v131_v50 = vmax.f32 %v106_v41, %v1068_v37  ;;  %v1104_v59 = vld [vmem:[%s1806_s0 + $0x298] sm:$0xff]  ;;  %v1115_v63 = vld [vmem:[%s1806_s0 + $0x2f0] sm:$0xff] }
  0x24   :  { %1189 = vmatmul.mubr.msk.bf16.gmra.mrb[4].mxu0 %vm257_vm0, %v235_v42  ;;  %v204_v51 = vmax.f32 %v179_v43, %v1102_v39  ;;  %v155_v55 = vmax.f32 %v130_v49, %v1079_v45  ;;  %v1116_v0 = vld [vmem:[%s1806_s0 + $0x2f8] sm:$0xff] }
  0x25   :  { %v228_v54 = vmax.f32 %v203_v47, %v1113_v44  ;;  %v156_v56 = vmax.f32 %v131_v50, %v1080_v46 }
  0x26   :  { %v229_v57 = vmax.f32 %v204_v51, %v1114_v48  ;;  %v180_v60 = vmax.f32 %v155_v55, %v1091_v52 }
  0x27   :  { %v181_v61 = vmax.f32 %v156_v56, %v1092_v53 }
  0x28   :  { %v236_v62 = vpack.c.bf16 %v229_v57, %v228_v54  ;;  %v205_v1 = vmax.f32 %v180_v60, %v1103_v58 }
  0x29   :  { %v206_v2 = vmax.f32 %v181_v61, %v1104_v59 }
  0x2a   :  { %1192 = vmatprep.mubr.msk.bf16.mxu0 %vm257_vm0, %v236_v62  ;;  %v230_v3 = vmax.f32 %v205_v1, %v1115_v63 }
  0x2b   :  { %v231_v4 = vmax.f32 %v206_v2, %v1116_v0 }
  0x2d   :  { %v237_v5 = vpack.c.bf16 %v231_v4, %v230_v3 }
  0x2f   :  { %1193 = vmatmul.mubr.msk.bf16.gmra.mrb[8].mxu0 %vm257_vm0, %v237_v5 }
  0x30   :  { %1242 = vmatprep.mubr.msk.f32.mxu0 %vm1286_vm2, %v1287_v19 }
  0xec   :  { %v1186_v8 = vpop.f32.mrb[0].mxu0 }
  0xed   :  { %v310_v9 = vpop.f32.mrb[1].mxu0  ;;  %v319_v13 = vadd.f32 %v1186_v8, %v1117_v7 }
  0xee   :  { %v311_v10 = vadd.f32 %v1117_v7, %v310_v9  ;;  %v1187_v11 = vpop.f32.mrb[2].mxu0 }
  0xef   :  { %v313_v12 = vpop.f32.mrb[3].mxu0  ;;  %v322_v15 = vadd.f32 %v1187_v11, %v1117_v7  ;;  %v361_v20 = vsel %vm357_vm1, %v319_v13, 0.0 }
  0xf0   :  { %v314_v14 = vadd.f32 %v1117_v7, %v313_v12  ;;  %v358_v16 = vsel %vm357_vm1, %v311_v10, 0.0 }
  0xf1   :  { %v363_v22 = vsel %vm357_vm1, %v322_v15, 0.0 }
  0xf2   :  { %v359_v17 = vsel %vm357_vm1, %v314_v14, 0.0 }
  0xf3   :  { %v360_v18 = vadd.f32 %v359_v17, %v358_v16 }
  0xf5   :  { %v362_v21 = vadd.f32 %v361_v20, %v360_v18 }
  0xf7   :  { %v1190_v23 = vpop.f32.mrb[4].mxu0  ;;  %v364_v25 = vadd.f32 %v363_v22, %v362_v21 }
  0xf8   :  { %v326_v24 = vpop.f32.mrb[5].mxu0  ;;  %v335_v29 = vadd.f32 %v1190_v23, %v1117_v7 }
  0xf9   :  { %v327_v26 = vadd.f32 %v1117_v7, %v326_v24  ;;  %v1191_v27 = vpop.f32.mrb[6].mxu0 }
  0xfa   :  { %v329_v28 = vpop.f32.mrb[7].mxu0  ;;  %v338_v33 = vadd.f32 %v1191_v27, %v1117_v7  ;;  %v369_v36 = vsel %vm357_vm1, %v335_v29, 0.0 }
  0xfb   :  { %v365_v30 = vsel %vm357_vm1, %v327_v26, 0.0  ;;  %v330_v31 = vadd.f32 %v1117_v7, %v329_v28 }
  0xfc   :  { %v366_v32 = vadd.f32 %v365_v30, %v364_v25  ;;  %v371_v38 = vsel %vm357_vm1, %v338_v33, 0.0 }
  0xfd   :  { %v367_v34 = vsel %vm357_vm1, %v330_v31, 0.0 }
  0xfe   :  { %v368_v35 = vadd.f32 %v367_v34, %v366_v32 }
 0x100   :  { %v370_v37 = vadd.f32 %v369_v36, %v368_v35 }
 0x102   :  { %v1194_v39 = vpop.f32.mrb[8].mxu0  ;;  %v372_v40 = vadd.f32 %v371_v38, %v370_v37 }
 0x103   :  { %v342_v41 = vpop.f32.mrb[9].mxu0  ;;  %v351_v45 = vadd.f32 %v1194_v39, %v1117_v7 }
 0x104   :  { %v343_v42 = vadd.f32 %v1117_v7, %v342_v41  ;;  %v1195_v43 = vpop.f32.mrb[10].mxu0 }
 0x105   :  { %v345_v44 = vpop.f32.mrb[11].mxu0  ;;  %v354_v49 = vadd.f32 %v1195_v43, %v1117_v7  ;;  %v377_v52 = vsel %vm357_vm1, %v351_v45, 0.0 }
 0x106   :  { %v373_v46 = vsel %vm357_vm1, %v343_v42, 0.0  ;;  %v346_v47 = vadd.f32 %v1117_v7, %v345_v44 }
 0x107   :  { %v374_v48 = vadd.f32 %v373_v46, %v372_v40  ;;  %v379_v54 = vsel %vm357_vm1, %v354_v49, 0.0 }
 0x108   :  { %v375_v50 = vsel %vm357_vm1, %v346_v47, 0.0 }
 0x109   :  { %v376_v51 = vadd.f32 %v375_v50, %v374_v48 }
 0x10b   :  { %v378_v53 = vadd.f32 %v377_v52, %v376_v51 }
 0x10d   :  { %v380_v55 = vadd.f32 %v379_v54, %v378_v53 }
 0x10f   :  { %v381_v56 = vrot.slane %v380_v55, 4 }
 0x111   :  { %v382_v57 = vadd.f32 %v381_v56, %v380_v55 }
 0x113   :  { %v383_v58 = vrot.slane %v382_v57, 2 }
 0x115   :  { %v384_v59 = vadd.f32 %v383_v58, %v382_v57  ;;  %v1124_v57 = vld [vmem:[%s1808_s3] ss:$0 sm:$0xff] }
 0x117   :  { %v385_v60 = vrot.slane %v384_v59, 1 }
 0x119   :  { %v386_v61 = vadd.f32 %v385_v60, %v384_v59 }
 0x11b   :  { %v388_v62 = vmul.f32 0.010416667, %v386_v61 }
 0x11d   :  { %v389_v63 = vsub.f32 %v311_v10, %v388_v62  ;;  %v390_v0 = vsub.f32 %v314_v14, %v388_v62  ;;  %v391_v1 = vsub.f32 %v319_v13, %v388_v62  ;;  %v392_v2 = vsub.f32 %v322_v15, %v388_v62 }
 0x11e   :  { %v393_v3 = vsub.f32 %v327_v26, %v388_v62  ;;  %v394_v4 = vsub.f32 %v330_v31, %v388_v62  ;;  %v395_v5 = vsub.f32 %v335_v29, %v388_v62  ;;  %v1697_v7 = vsub.f32 %v338_v33, %v388_v62 }
 0x11f   :  { %v1699_v8 = vsub.f32 %v343_v42, %v388_v62  ;;  %v398_v9 = vsub.f32 %v346_v47, %v388_v62  ;;  %v1701_v11 = vsub.f32 %v351_v45, %v388_v62  ;;  %v1703_v12 = vsub.f32 %v354_v49, %v388_v62  ;;  %v1125_v62 = vld [vmem:[%s1809_s4] ss:$0 sm:$0xff] }
 0x120   :  { %v401_v16 = vmul.f32 %v389_v63, %v389_v63  ;;  %v402_v17 = vmul.f32 %v390_v0, %v390_v0  ;;  %v403_v18 = vmul.f32 %v391_v1, %v391_v1  ;;  %v404_v20 = vmul.f32 %v392_v2, %v392_v2 }
 0x121   :  { %v405_v15 = vmul.f32 %v393_v3, %v393_v3  ;;  %v406_v23 = vmul.f32 %v394_v4, %v394_v4  ;;  %v407_v26 = vmul.f32 %v395_v5, %v395_v5  ;;  %v408_v29 = vmul.f32 %v1697_v7, %v1697_v7 }
 0x122   :  { %v413_v10 = vsel %vm357_vm1, %v401_v16, 0.0  ;;  %v414_v13 = vsel %vm357_vm1, %v402_v17, 0.0  ;;  %v416_v21 = vsel %vm357_vm1, %v403_v18, 0.0  ;;  %v418_v24 = vsel %vm357_vm1, %v404_v20, 0.0 }
 0x123   :  { %v415_v14 = vadd.f32 %v414_v13, %v413_v10  ;;  %v420_v27 = vsel %vm357_vm1, %v405_v15, 0.0  ;;  %v422_v30 = vsel %vm357_vm1, %v406_v23, 0.0  ;;  %v409_v32 = vmul.f32 %v1699_v8, %v1699_v8 }
 0x124   :  { %v424_v33 = vsel %vm357_vm1, %v407_v26, 0.0  ;;  %v410_v35 = vmul.f32 %v398_v9, %v398_v9  ;;  %v426_v36 = vsel %vm357_vm1, %v408_v29, 0.0  ;;  %v411_v38 = vmul.f32 %v1701_v11, %v1701_v11 }
 0x125   :  { %v417_v22 = vadd.f32 %v416_v21, %v415_v14  ;;  %v428_v39 = vsel %vm357_vm1, %v409_v32, 0.0  ;;  %v412_v41 = vmul.f32 %v1703_v12, %v1703_v12 }
 0x126   :  { %v430_v42 = vsel %vm357_vm1, %v410_v35, 0.0  ;;  %v432_v44 = vsel %vm357_vm1, %v411_v38, 0.0 }
 0x127   :  { %v419_v25 = vadd.f32 %v418_v24, %v417_v22  ;;  %v434_v46 = vsel %vm357_vm1, %v412_v41, 0.0 }
 0x129   :  { %v421_v28 = vadd.f32 %v420_v27, %v419_v25 }
 0x12b   :  { %v423_v31 = vadd.f32 %v422_v30, %v421_v28 }
 0x12d   :  { %v425_v34 = vadd.f32 %v424_v33, %v423_v31 }
 0x12f   :  { %v427_v37 = vadd.f32 %v426_v36, %v425_v34 }
 0x131   :  { %v429_v40 = vadd.f32 %v428_v39, %v427_v37 }
 0x133   :  { %v431_v43 = vadd.f32 %v430_v42, %v429_v40 }
 0x135   :  { %v433_v45 = vadd.f32 %v432_v44, %v431_v43 }
 0x137   :  { %v435_v47 = vadd.f32 %v434_v46, %v433_v45 }
 0x139   :  { %v436_v48 = vrot.slane %v435_v47, 4 }
 0x13b   :  { %v437_v49 = vadd.f32 %v436_v48, %v435_v47 }
 0x13d   :  { %v438_v50 = vrot.slane %v437_v49, 2 }
 0x13f   :  { %v439_v51 = vadd.f32 %v438_v50, %v437_v49 }
 0x141   :  { %v440_v52 = vrot.slane %v439_v51, 1 }
 0x143   :  { %v441_v53 = vadd.f32 %v440_v52, %v439_v51  ;;  %v583_v52 = vld [vmem:[%s1811_s7] sm:$0xff] }
 0x145   :  { %v442_v54 = vmul.f32 0.010416667, %v441_v53 }
 0x147   :  { %v443_v55 = vadd.f32 1e-05, %v442_v54  ;;  %v629_v54 = vld [vmem:[%s1812_s8] sm:$0xff] }
 0x149   :  { %1277 = vrsqrt.f32 %v443_v55  ;;  %v630_v55 = vld [vmem:[%s1812_s8 + $0x8] sm:$0xff] }
 0x153   :  { %v1278_v56 = vpop.eup %1277 }
 0x154   :  { %v454_v58 = vmul.f32 %v1278_v56, %v398_v9  ;;  %v445_v59 = vmul.f32 %v1278_v56, %v389_v63  ;;  %v446_v60 = vmul.f32 %v1278_v56, %v390_v0  ;;  %v447_v61 = vmul.f32 %v1278_v56, %v391_v1 }
 0x155   :  { %v448_v16 = vmul.f32 %v1278_v56, %v392_v2  ;;  %v449_v17 = vmul.f32 %v1278_v56, %v393_v3  ;;  %v450_v18 = vmul.f32 %v1278_v56, %v394_v4  ;;  %v451_v20 = vmul.f32 %v1278_v56, %v395_v5 }
 0x156   :  { %v473_v10 = vmul.f32 %v1124_v57, %v454_v58  ;;  %v464_v13 = vmul.f32 %v1124_v57, %v445_v59  ;;  %v465_v14 = vmul.f32 %v1124_v57, %v446_v60  ;;  %v466_v15 = vmul.f32 %v1124_v57, %v447_v61  ;;  %v672_v60 = vld [vmem:[%s1813_s6] sm:$0x3f]  ;;  %v1131_v61 = vld [vmem:[%s1813_s6 + $0x8] sm:$0x3f] }
 0x157   :  { %v467_v21 = vmul.f32 %v1124_v57, %v448_v16  ;;  %v468_v22 = vmul.f32 %v1124_v57, %v449_v17  ;;  %v469_v23 = vmul.f32 %v1124_v57, %v450_v18  ;;  %v452_v9 = vmul.f32 %v1278_v56, %v1697_v7 }
 0x158   :  { %v483_v63 = vadd.f32 %v1125_v62, %v464_v13  ;;  %v484_v0 = vadd.f32 %v1125_v62, %v465_v14  ;;  %v485_v1 = vadd.f32 %v1125_v62, %v466_v15  ;;  %v470_v24 = vmul.f32 %v1124_v57, %v451_v20  ;;  %v1134_v20 = vld [vmem:[%s1813_s6 + $0x10] sm:$0x3f] }
 0x159   :  { %v486_v25 = vadd.f32 %v1125_v62, %v467_v21  ;;  %v487_v26 = vadd.f32 %v1125_v62, %v468_v22  ;;  %v488_v27 = vadd.f32 %v1125_v62, %v469_v23  ;;  %v471_v2 = vmul.f32 %v1124_v57, %v452_v9  ;;  %v968_v21 = vld [vmem:[%s1814_s11] sm:$0xff]  ;;  %v969_v22 = vld [vmem:[%s1814_s11 + $0x8] sm:$0xff] }
 0x15a   :  { %v495_v3 = vmax.f32 %v483_v63, 0.0  ;;  %v496_v4 = vmax.f32 %v484_v0, 0.0  ;;  %v497_v5 = vmax.f32 %v485_v1, 0.0  ;;  %v489_v28 = vadd.f32 %v1125_v62, %v470_v24 }
 0x15b   :  { %v498_v29 = vmax.f32 %v486_v25, 0.0  ;;  %v499_v30 = vmax.f32 %v487_v26, 0.0  ;;  %v500_v31 = vmax.f32 %v488_v27, 0.0  ;;  %v490_v32 = vadd.f32 %v1125_v62, %v471_v2 }
 0x15c   :  { %v1257_v33 = vpack.c.bf16 %v496_v4, %v495_v3  ;;  %v501_v34 = vmax.f32 %v489_v28, 0.0  ;;  %v453_v7 = vmul.f32 %v1278_v56, %v1699_v8  ;;  %v492_v35 = vadd.f32 %v1125_v62, %v473_v10 }
 0x15d   :  { %v1260_v36 = vpack.c.bf16 %v498_v29, %v497_v5  ;;  %v1263_v37 = vpack.c.bf16 %v500_v31, %v499_v30  ;;  %v502_v38 = vmax.f32 %v490_v32, 0.0  ;;  %v455_v39 = vmul.f32 %v1278_v56, %v1701_v11 }
 0x15e   :  { %1258 = vmatpush3.bf16.msra.mxu1 %v1257_v33  ;;  %v472_v40 = vmul.f32 %v1124_v57, %v453_v7  ;;  %v456_v41 = vmul.f32 %v1278_v56, %v1703_v12  ;;  %v504_v45 = vmax.f32 %v492_v35, 0.0  ;;  %v507_v12 = vld [vmem:[%s1810_s5] sm:$0x3f]  ;;  %v970_v23 = vpack.c.bf16 %v969_v22, %v968_v21 }
 0x15f   :  { %1259 = vmatprep.subr.bf16.mxu1 %v1285_v6  ;;  %v1266_v42 = vpack.c.bf16 %v502_v38, %v501_v34  ;;  %v474_v43 = vmul.f32 %v1124_v57, %v455_v39  ;;  %v1138_v22 = vld [vmem:[%s1817_s12] ss:$0 sm:$0xff] }
 0x160   :  { %v491_v44 = vadd.f32 %v1125_v62, %v472_v40  ;;  %v475_v46 = vmul.f32 %v1124_v57, %v456_v41  ;;  %v631_v57 = vpack.c.bf16 %v630_v55, %v629_v54 }
 0x161   :  { %v493_v47 = vadd.f32 %v1125_v62, %v474_v43 }
 0x162   :  { %1261 = vmatpush3.bf16.msra.mxu1 %v1260_v36  ;;  %v503_v8 = vmax.f32 %v491_v44, 0.0  ;;  %v494_v48 = vadd.f32 %v1125_v62, %v475_v46 }
 0x163   :  { %1262 = vmatprep.subr.bf16.mxu1 %v1285_v6  ;;  %v505_v49 = vmax.f32 %v493_v47, 0.0 }
 0x164   :  { %v1269_v50 = vpack.c.bf16 %v504_v45, %v503_v8  ;;  %v506_v11 = vmax.f32 %v494_v48, 0.0 }
 0x166   :  { %1264 = vmatpush3.bf16.msra.mxu1 %v1263_v37  ;;  %v1272_v51 = vpack.c.bf16 %v506_v11, %v505_v49 }
 0x167   :  { %1265 = vmatprep.subr.bf16.mxu1 %v1285_v6 }
 0x16a   :  { %1267 = vmatpush3.bf16.msra.mxu1 %v1266_v42 }
 0x16b   :  { %1268 = vmatprep.subr.bf16.mxu1 %v1285_v6 }
 0x16e   :  { %1270 = vmatpush3.bf16.msra.mxu1 %v1269_v50 }
 0x16f   :  { %1271 = vmatprep.subr.bf16.mxu1 %v1285_v6  ;;  %v584_v6 = vld [vmem:[%s1811_s7 + $0x8] sm:$0xff] }
 0x170   :  { %v585_v53 = vpack.c.bf16 %v584_v6, %v583_v52  ;;  %v937_v52 = vld [vmem:[%s1815_s9] sm:$0x1] }
 0x172   :  { %1273 = vmatpush3.bf16.msra.mxu1 %v1272_v51  ;;  %v939_v51 = vlaneseq }
 0x173   :  { %1223 = vmatprep.subr.bf16.mxu1 %v1287_v19 }
 0x175   :  { %1221 = vmatmul.mubr.msk.f32.vlgmr.msra.gmra.mrb[0].mxu1 %vm508_vm3, %v507_v12  ;;  %v940_v12 = vshrl.u32 %v939_v51, 7 }
 0x176   :  { %1225 = vmatprep.mubr.msk.bf16.mxu1 %vm1286_vm2, %v1287_v19  ;;  %1224 = vmatpush3.bf16.msra.mxu1 %v585_v53 }
 0x177   :  { %1229 = vmatprep.subr.bf16.mxu1 %v1287_v19  ;;  %v941_v6 = vsub.s32 0, %v940_v12 }
 0x248   :  { %v578_v56 = vpop.f32.mrb[0].mxu1 }
 0x249   :  { %v582_v58 = vpack.c.bf16 %v578_v56, %v578_v56  ;;  %v1222_v59 = vpop.f32.mrb[1].mxu1  ;;  %v1137_v56 = vld [vmem:[%s1816_s10] ss:$0 sm:$0xff] }
 0x24b   :  { %1226 = vmatmul.mubr.msk.bf16.vlgmr.msra.gmra.mrb[4].mxu1 %vm357_vm1, %v582_v58 }
 0x24c   :  { %1230 = vmatpush3.bf16.msra.mxu1 %v631_v57  ;;  %1231 = vmatprep.mubr.msk.bf16.mxu1 %vm1286_vm2, %v1287_v19 }
 0x24d   :  { %1235 = vmatprep.subr.mxu1 %v1287_v19 }
 0x253   :  { %1232 = vmatmul.mubr.msk.bf16.vlgmr.msra.gmra.mrb[8].mxu1 %vm357_vm1, %v582_v58 }
 0x254   :  { %1237 = vmatprep.mubr.msk.f32.mxu1 %vm1286_vm2, %v1287_v19 }
 0x31e   :  { %v623_v62 = vpop.f32.mrb[4].mxu1 }
 0x31f   :  { %v1227_v16 = vpop.f32.mrb[5].mxu1  ;;  %1236 = vmatpush3.msk.msra.mxu1 %vm677_vm4, %v623_v62  ;;  %1241 = vmatpush3.msk.msra.mxu0 %vm677_vm4, %v623_v62 }
 0x320   :  { %v626_v17 = vpop.f32.mrb[6].mxu1  ;;  %1238 = vmatmul.mubr.msk.f32.vlgmr.msra.gmra.mrb[2].mxu1 %vm673_vm5, %v672_v60  ;;  %1243 = vmatmul.mubr.msk.f32.vlgmr.msra.gmra.mrb[12].mxu0 %vm673_vm5, %v1131_v61 }
 0x321   :  { %1245 = vmatprep.subr.mxu1 %v1287_v19  ;;  %v1228_v18 = vpop.f32.mrb[7].mxu1  ;;  %1247 = vmatprep.mubr.msk.f32.mxu1 %vm1286_vm2, %v1287_v19 }
 0x322   :  { %1246 = vmatpush3.msk.msra.mxu1 %vm677_vm4, %v623_v62  ;;  %1250 = vmatprep.subr.bf16.mxu0 %v1287_v19 }
 0x323   :  { %1252 = vmatprep.mubr.msk.bf16.mxu0 %vm1286_vm2, %v1287_v19  ;;  %1251 = vmatpush3.bf16.msra.mxu0 %v970_v23 }
 0x324   :  { %1248 = vmatmul.mubr.msk.f32.vlgmr.msra.gmra.mrb[12].mxu1 %vm673_vm5, %v1134_v20 }
 0x326   :  { %v666_v10 = vpop.f32.mrb[8].mxu1 }
 0x327   :  { %v1233_v13 = vpop.f32.mrb[9].mxu1 }
 0x328   :  { %v669_v14 = vpop.f32.mrb[10].mxu1 }
 0x329   :  { %v1234_v15 = vpop.f32.mrb[11].mxu1 }
 0x3f3   :  { %v747_v9 = vpop.f32.mrb[2].mxu1  ;;  %v824_v63 = vpop.f32.mrb[12].mxu0 }
 0x3f4   :  { %v751_v0 = vsub.f32 %v747_v9, %v623_v62  ;;  %v828_v19 = vsub.f32 %v824_v63, %v623_v62  ;;  %v1239_v1 = vpop.f32.mrb[3].mxu1  ;;  %v1244_v24 = vpop.f32.mrb[13].mxu0 }
 0x3f6   :  { %v752_v25 = vadd.f32 %v751_v0, %v666_v10  ;;  %v829_v26 = vadd.f32 %v828_v19, %v666_v10 }
 0x3f7   :  { %v901_v27 = vpop.f32.mrb[12].mxu1 }
 0x3f8   :  { %v907_v2 = vadd.f32 %v829_v26, %v752_v25  ;;  %v905_v3 = vsub.f32 %v901_v27, %v623_v62  ;;  %v1249_v4 = vpop.f32.mrb[13].mxu1 }
 0x3fa   :  { %v906_v5 = vadd.f32 %v905_v3, %v666_v10 }
 0x3fc   :  { %v908_v28 = vadd.f32 %v907_v2, %v906_v5 }
 0x3fe   :  { %v910_v29 = vsel %vm909_vm6, %v908_v28, 0.0 }
 0x3ff   :  { %v911_v30 = vrot.slane %v910_v29, 4 }
 0x401   :  { %v912_v31 = vadd.f32 %v911_v30, %v910_v29 }
 0x403   :  { %v913_v32 = vrot.slane %v912_v31, 2 }
 0x405   :  { %v914_v33 = vadd.f32 %v913_v32, %v912_v31 }
 0x407   :  { %v915_v34 = vrot.slane %v914_v33, 1 }
 0x409   :  { %v916_v7 = vadd.f32 %v915_v34, %v914_v33 }
 0x40b   :  { %v918_v35 = vmul.f32 0.055555556, %v916_v7 }
 0x40d   :  { %v919_v36 = vsub.f32 %v752_v25, %v918_v35  ;;  %v921_v37 = vsub.f32 %v829_v26, %v918_v35  ;;  %v924_v38 = vsub.f32 %v906_v5, %v918_v35 }
 0x40f   :  { %v920_v39 = vmul.f32 %v919_v36, %v919_v36  ;;  %v922_v40 = vmul.f32 %v921_v37, %v921_v37  ;;  %v925_v42 = vmul.f32 %v924_v38, %v924_v38 }
 0x411   :  { %v923_v41 = vadd.f32 %v922_v40, %v920_v39 }
 0x413   :  { %v926_v43 = vadd.f32 %v925_v42, %v923_v41 }
 0x415   :  { %v927_v44 = vsel %vm909_vm6, %v926_v43, 0.0 }
 0x416   :  { %v928_v45 = vrot.slane %v927_v44, 4 }
 0x418   :  { %v929_v46 = vadd.f32 %v928_v45, %v927_v44 }
 0x41a   :  { %v930_v47 = vrot.slane %v929_v46, 2 }
 0x41c   :  { %v931_v8 = vadd.f32 %v930_v47, %v929_v46 }
 0x41e   :  { %v932_v48 = vrot.slane %v931_v8, 1 }
 0x420   :  { %v933_v49 = vadd.f32 %v932_v48, %v931_v8 }
 0x422   :  { %v934_v50 = vmul.f32 0.055555556, %v933_v49 }
 0x424   :  { %v935_v11 = vadd.f32 1e-05, %v934_v50 }
 0x426   :  { %1279 = vrsqrt.f32 %v935_v11 }
 0x430   :  { %v1280_v53 = vpop.eup %1279 }
 0x431   :  { %v938_v54 = vmul.f32 %v1280_v53, %v937_v52 }
 0x433   :  { %v942_v55 = vrot.slane %v938_v54, %v941_v6 }
 0x435   :  { %v943_v57 = vmul.f32 %v942_v55, %v919_v36  ;;  %v955_v58 = vmul.f32 %v942_v55, %v921_v37  ;;  %v961_v59 = vmul.f32 %v942_v55, %v924_v38 }
 0x437   :  { %v951_v60 = vadd.f32 %v1137_v56, %v943_v57  ;;  %v956_v61 = vadd.f32 %v1137_v56, %v955_v58  ;;  %v962_v62 = vadd.f32 %v1137_v56, %v961_v59 }
 0x439   :  { %vm952_vm7 = vcmp.ge.f32.partialorder %v951_v60, 0.0  ;;  %v953_v16 = vmul.f32 0.2, %v951_v60  ;;  %vm957_vm8 = vcmp.ge.f32.partialorder %v956_v61, 0.0  ;;  %v958_v17 = vmul.f32 0.2, %v956_v61 }
 0x43a   :  { %vm963_vm9 = vcmp.ge.f32.partialorder %v962_v62, 0.0  ;;  %v964_v18 = vmul.f32 0.2, %v962_v62 }
 0x43b   :  { %v954_v20 = vsel %vm952_vm7, %v951_v60, %v953_v16  ;;  %v959_v10 = vsel %vm957_vm8, %v956_v61, %v958_v17 }
 0x43c   :  { %v960_v13 = vmax.f32 %v954_v20, %v959_v10  ;;  %v965_v14 = vsel %vm963_vm9, %v962_v62, %v964_v18 }
 0x43e   :  { %v966_v15 = vmax.f32 %v960_v13, %v965_v14 }
 0x440   :  { %v967_v21 = vpack.c.bf16 %v966_v15, %v966_v15 }
 0x442   :  { %1253 = vmatmul.mubr.msk.bf16.vlgmr.msra.gmra.mrb[16].mxu0 %vm357_vm1, %v967_v21 }
 0x515   :  { %v1015_v23 = vpop.f32.mrb[16].mxu0 }
 0x516   :  { %v1016_v9 = vadd.f32 %v1138_v22, %v1015_v23  ;;  %v1254_v63 = vpop.f32.mrb[17].mxu0 }
 0x517   :  { %v1018_v0 = vpop.f32.mrb[18].mxu0 }
 0x518   :  { %v1140_v19 = vmul.f32 -1.442695, %v1016_v9  ;;  %v1255_v1 = vpop.f32.mrb[19].mxu0 }
 0x51a   :  { %1281 = vpow2.f32 %v1140_v19 }
 0x524   :  { %v1282_v24 = vpop.eup %1281 }
 0x525   :  { %v1024_v25 = vadd.f32 1.0, %v1282_v24 }
 0x527   :  { %1283 = vrcp.f32 %v1024_v25 }
 0x531   :  { %v1284_v26 = vpop.eup %1283 }
 0x532   :  { %1028 = vst.msk [vmem:[%s1818_s13] sm:$0x3f] %vm1027_vm10, %v1284_v26 }

// kernel: a_crhta_forward.3
= control target key start
LH: loop header
LB: loop body
LE: loop exit
PB: predicated region body
PF: predicated region fallthrough
CT: control target
= control target key end

     0   :  { %s473_s9 = smov 0   ;;  %s546_s0 = inlined_call_operand.vmem [shape: f32[2,64,384], index: 0, kind: input, shape index: {}]   ;;  %s547_s1 = inlined_call_operand.vmem [shape: f32[2,64,3], index: 1, kind: input, shape index: {}]   ;;  %s548_s2 = inlined_call_operand.vmem [shape: f32[2,64,128], index: 2, kind: output, shape index: {}]  }
   0x1 LB: > { %s415_s10 = sadd.s32 4294967295, %s453_s9   ;;  %p419_p0 = scmp.ge.s32.totalorder %s453_s9, 1  ;;  %s453_s9 = sphi %s473_s9, %s12_s9  }
   0x2   : > { %p122_p1 = scmp.lt.s32.totalorder %s453_s9, 3 }
   0x4   : > { %p123_p2 = pnand %p419_p0, %p122_p1 }
   0x5   : > { %p149_p3 = scmp.lt.s32.totalorder (!%p123_p2), %s415_s10, 1  ;;  %v455_v0 = vmov (!%p123_p2), 0   ;;  %v456_v9 = vmov (!%p123_p2), 1   ;;  %v457_v10 = vmov (!%p123_p2), 2  }
   0x6   : > { %126 = sbr.rel (%p123_p2) target bundleno = 200 (0xc8), region = 28  ;;  %442 = vset.pattern.permute.xlu1 (!%p123_p2), %v455_v0  ;;  %441 = vset.pattern.permute.xlu0 (!%p123_p2), %v455_v0 }
   0xd   : > { %s550_s10 = smov (!%p149_p3, %s415_s10), 1 }
   0xe   : > { %s427_s11 = sshll.u32 %s550_s10, 6  ;;  %s429_s15 = smul.u32 192, %s550_s10 }
   0xf   : > { %s158_s14 = scalar_lea.vmem %s547_s1, %s427_s11  ;;  %s517_s21 = scalar_lea.vmem %s548_s2, %s427_s11 }
  0x10   : > { %v166_v1 = vld [vmem:[%s158_s14 + $0x10] sm:$0xff]  ;;  %v164_v2 = vld [vmem:[%s158_s14] sm:$0xff]  ;;  %v167_v3 = vld [vmem:[%s158_s14 + $0x18] sm:$0xff]  ;;  %s497_s18 = scalar_lea.vmem %s546_s0, %s429_s15 }
  0x11   : > { %192 = vperm.xlu1 %442, %v166_v1   ;;  %182 = vperm.xlu0 %441, %v164_v2   ;;  %v165_v4 = vld [vmem:[%s158_s14 + $0x8] sm:$0xff]  ;;  %v168_v6 = vld [vmem:[%s158_s14 + $0x20] sm:$0xff]  ;;  %v171_v7 = vld [vmem:[%s158_s14 + $0x38] sm:$0xff] }
  0x12   : > { %v169_v5 = vld [vmem:[%s158_s14 + $0x28] sm:$0xff]  ;;  %v170_v8 = vld [vmem:[%s158_s14 + $0x30] sm:$0xff]  ;;  %v229_v25 = vld [vmem:[%s497_s18 + $0x20] sm:$0xff] }
  0x13   : > { %v228_v26 = vld [vmem:[%s497_s18 + $0x8] sm:$0xff]  ;;  %v173_v27 = vld [vmem:[%s497_s18 + $0x18] sm:$0xff]  ;;  %v172_v30 = vld [vmem:[%s497_s18] sm:$0xff] }
  0x14   : > { %v230_v33 = vld [vmem:[%s497_s18 + $0x38] sm:$0xff]  ;;  %v232_v35 = vld [vmem:[%s497_s18 + $0x68] sm:$0xff]  ;;  %v284_v36 = vld [vmem:[%s497_s18 + $0x10] sm:$0xff] }
  0x15   : > { %197 = vperm.xlu1 %442, %v167_v3   ;;  %187 = vperm.xlu0 %441, %v165_v4   ;;  %v285_v37 = vld [vmem:[%s497_s18 + $0x28] sm:$0xff]  ;;  %v174_v38 = vld [vmem:[%s497_s18 + $0x30] sm:$0xff]  ;;  %v176_v40 = vld [vmem:[%s497_s18 + $0x60] sm:$0xff] }
  0x16   : > { %v231_v46 = vld [vmem:[%s497_s18 + $0x50] sm:$0xff]  ;;  %v234_v51 = vld [vmem:[%s497_s18 + $0x98] sm:$0xff]  ;;  %v286_v52 = vld [vmem:[%s497_s18 + $0x40] sm:$0xff] }
  0x17   : > { %v288_v53 = vld [vmem:[%s497_s18 + $0x70] sm:$0xff]  ;;  %v175_v54 = vld [vmem:[%s497_s18 + $0x48] sm:$0xff] }
  0x18   : > { %v178_v58 = vld [vmem:[%s497_s18 + $0x90] sm:$0xff] }
  0x19   : > { %207 = vperm.xlu1 %442, %v169_v5   ;;  %202 = vperm.xlu0 %441, %v168_v6  }
  0x1d   : > { %217 = vperm.xlu1 %442, %v171_v7   ;;  %212 = vperm.xlu0 %441, %v170_v8  }
  0x21   : > { %444 = vset.pattern.permute.xlu1 %v456_v9  ;;  %443 = vset.pattern.permute.xlu0 %v456_v9 }
  0x22   : > { %241 = vperm.xlu1 %444, %v165_v4   ;;  %237 = vperm.xlu0 %443, %v164_v2  }
  0x26   : > { %245 = vperm.xlu1 %444, %v166_v1   ;;  %249 = vperm.xlu0 %443, %v167_v3  }
  0x2a   : > { %253 = vperm.xlu1 %444, %v168_v6   ;;  %257 = vperm.xlu0 %443, %v169_v5  }
  0x2e   : > { %261 = vperm.xlu1 %444, %v170_v8   ;;  %265 = vperm.xlu0 %443, %v171_v7  }
  0x32   : > { %445 = vset.pattern.permute.xlu1 %v457_v10  ;;  %446 = vset.pattern.permute.xlu0 %v457_v10  ;;  %v177_v10 = vld [vmem:[%s497_s18 + $0x78] sm:$0xff] }
  0x33   : > { %293 = vperm.xlu1 %445, %v164_v2   ;;  %297 = vperm.xlu0 %446, %v165_v4   ;;  %v233_v4 = vld [vmem:[%s497_s18 + $0x80] sm:$0xff] }
  0x37   : > { %301 = vperm.xlu1 %445, %v166_v1   ;;  %309 = vperm.xlu0 %446, %v168_v6   ;;  %v290_v6 = vld [vmem:[%s497_s18 + $0xa0] sm:$0xff] }
  0x3b   : > { %305 = vperm.xlu1 %445, %v167_v3   ;;  %317 = vperm.xlu0 %446, %v170_v8  }
  0x3f   : > { %313 = vperm.xlu1 %445, %v169_v5   ;;  %v287_v5 = vld [vmem:[%s497_s18 + $0x58] sm:$0xff] }
  0x43   : > { %321 = vperm.xlu1 %445, %v171_v7  }
  0x90   : > { %v193_v11 = vpop.permute.xlu1 %192  ;;  %v183_v12 = vpop.permute.xlu0 %182 }
  0x91   : > { %v220_v39 = vmul.f32 %v183_v12, %v172_v30  ;;  %v222_v50 = vmul.f32 %v193_v11, %v174_v38 }
  0x94   : > { %v198_v13 = vpop.permute.xlu1 %197  ;;  %v188_v14 = vpop.permute.xlu0 %187 }
  0x95   : > { %v221_v34 = vmul.f32 %v188_v14, %v173_v27  ;;  %v223_v3 = vmul.f32 %v198_v13, %v175_v54 }
  0x98   : > { %v489_v15 = vpop.permute.xlu1 %207  ;;  %v203_v16 = vpop.permute.xlu0 %202 }
  0x99   : > { %v224_v55 = vmul.f32 %v203_v16, %v176_v40 }
  0x9c   : > { %v491_v17 = vpop.permute.xlu1 %217  ;;  %v213_v18 = vpop.permute.xlu0 %212 }
  0x9d   : > { %v226_v7 = vmul.f32 %v213_v18, %v178_v58  ;;  %v225_v18 = vmul.f32 %v489_v15, %v177_v10 }
  0xa1   : > { %v242_v19 = vpop.permute.xlu1 %241  ;;  %v238_v20 = vpop.permute.xlu0 %237 }
  0xa2   : > { %v269_v31 = vmul.f32 %v242_v19, %v229_v25  ;;  %v268_v32 = vmul.f32 %v238_v20, %v228_v26  ;;  %v179_v26 = vld [vmem:[%s497_s18 + $0xa8] sm:$0xff] }
  0xa4   : > { %v277_v41 = vadd.f32 %v269_v31, %v221_v34  ;;  %v276_v45 = vadd.f32 %v268_v32, %v220_v39  ;;  %v291_v31 = vld [vmem:[%s497_s18 + $0xb8] sm:$0xff]  ;;  %v227_v32 = vmul.f32 %v491_v17, %v179_v26 }
  0xa5   : > { %v246_v21 = vpop.permute.xlu1 %245  ;;  %v250_v22 = vpop.permute.xlu0 %249 }
  0xa6   : > { %v270_v42 = vmul.f32 %v246_v21, %v230_v33  ;;  %v271_v60 = vmul.f32 %v250_v22, %v231_v46  ;;  %v235_v21 = vld [vmem:[%s497_s18 + $0xb0] sm:$0xff]  ;;  %v289_v22 = vld [vmem:[%s497_s18 + $0x88] sm:$0xff] }
  0xa8   : > { %v278_v59 = vadd.f32 %v270_v42, %v222_v50  ;;  %v279_v11 = vadd.f32 %v271_v60, %v223_v3 }
  0xa9   : > { %v254_v23 = vpop.permute.xlu1 %253  ;;  %v258_v24 = vpop.permute.xlu0 %257 }
  0xaa   : > { %v272_v47 = vmul.f32 %v254_v23, %v232_v35  ;;  %v273_v16 = vmul.f32 %v258_v24, %v233_v4 }
  0xac   : > { %v280_v63 = vadd.f32 %v272_v47, %v224_v55 }
  0xad   : > { %v262_v28 = vpop.permute.xlu1 %261  ;;  %v502_v29 = vpop.permute.xlu0 %265 }
  0xae   : > { %v274_v0 = vmul.f32 %v262_v28, %v234_v51  ;;  %v281_v28 = vadd.f32 %v273_v16, %v225_v18  ;;  %v275_v24 = vmul.f32 %v502_v29, %v235_v21 }
  0xb0   : > { %v282_v19 = vadd.f32 %v274_v0, %v226_v7  ;;  %v283_v35 = vadd.f32 %v275_v24, %v227_v32 }
  0xb2   : > { %v294_v43 = vpop.permute.xlu1 %293  ;;  %v298_v44 = vpop.permute.xlu0 %297 }
  0xb3   : > { %v324_v48 = vmul.f32 %v294_v43, %v284_v36  ;;  %v325_v49 = vmul.f32 %v298_v44, %v285_v37 }
  0xb5   : > { %v332_v56 = vadd.f32 %v324_v48, %v276_v45  ;;  %v333_v57 = vadd.f32 %v325_v49, %v277_v41 }
  0xb6   : > { %v302_v61 = vpop.permute.xlu1 %301  ;;  %v310_v62 = vpop.permute.xlu0 %309 }
  0xb7   : > { %340 = vst [vmem:[%s517_s21] sm:$0xff] %v332_v56  ;;  %341 = vst [vmem:[%s517_s21 + $0x8] sm:$0xff] %v333_v57  ;;  %v326_v1 = vmul.f32 %v302_v61, %v286_v52  ;;  %v328_v2 = vmul.f32 %v310_v62, %v288_v53 }
  0xb9   : > { %v334_v8 = vadd.f32 %v326_v1, %v278_v59  ;;  %v336_v9 = vadd.f32 %v328_v2, %v280_v63 }
  0xba   : > { %v306_v12 = vpop.permute.xlu1 %305  ;;  %v318_v14 = vpop.permute.xlu0 %317 }
  0xbb   : > { %342 = vst [vmem:[%s517_s21 + $0x10] sm:$0xff] %v334_v8  ;;  %344 = vst [vmem:[%s517_s21 + $0x20] sm:$0xff] %v336_v9  ;;  %v327_v13 = vmul.f32 %v306_v12, %v287_v5  ;;  %v330_v20 = vmul.f32 %v318_v14, %v290_v6 }
  0xbd   : > { %v335_v23 = vadd.f32 %v327_v13, %v279_v11  ;;  %v338_v25 = vadd.f32 %v330_v20, %v282_v19 }
  0xbe   : > { %v314_v27 = vpop.permute.xlu1 %313 }
  0xbf   : > { %343 = vst [vmem:[%s517_s21 + $0x18] sm:$0xff] %v335_v23  ;;  %346 = vst [vmem:[%s517_s21 + $0x30] sm:$0xff] %v338_v25  ;;  %v329_v30 = vmul.f32 %v314_v27, %v289_v22 }
  0xc1   : > { %v337_v33 = vadd.f32 %v329_v30, %v281_v28 }
  0xc2   : > { %v322_v34 = vpop.permute.xlu1 %321 }
  0xc3   : > { %345 = vst [vmem:[%s517_s21 + $0x28] sm:$0xff] %v337_v33  ;;  %v331_v36 = vmul.f32 %v322_v34, %v291_v31 }
  0xc5   : > { %v339_v15 = vadd.f32 %v331_v36, %v283_v35 }
  0xc7   : > { %347 = vst [vmem:[%s517_s21 + $0x38] sm:$0xff] %v339_v15 }
  0xc8 PF: > { %s12_s9 = sadd.s32 1, %s453_s9  }
  0xc9   : > { %p9_p4 = scmp.ge.s32.totalorder %s12_s9, 4  }
  0xcb   :  { %11 = sbr.rel (!%p9_p4) target bundleno = 1 (0x1), region = 61 }

</bundles_post_ra>
